<compile_context>
chip_gen: v6e
topology: v6e:2x2x1
jax: 0.10.0
libtpu: 0.0.40
codegen_flags: <defaults>
</compile_context>

<pallas_src>
import functools

import jax
import jax.numpy as jnp
from jax.experimental import pallas as pl
from jax.experimental.pallas import tpu as pltpu

# ----- synthetic hyperparameters (matching the module's __init__ shapes) -----
INPUT_DIM = 8
HIDDEN = 32
NUM_LAYERS = 2
NUM_ANGLE_BINS = 16
NUM_SPEED_BINS = 16
OUT_DIM = NUM_ANGLE_BINS + NUM_SPEED_BINS
LN_EPS = 1e-5
# TODO(synk): nn.Dropout is identity at inference; no stochastic masking is done here.


def _lstm_mm_kernel(T, B, L, H,
                    x_ref, h0_ref, c0_ref,
                    w_in_ref, b_big_ref, w_big_ref,
                    ln_g_ref, ln_b_ref, wi_ref, bi_ref, wo_ref, bo_ref,
                    out_ref, hN_ref, cN_ref):
    """Entire forward pass in a single invocation; everything VMEM-resident.

    Packed layouts (built by the wrapper):
      h0/c0:   (B, L*H)     layer-major along lanes.
      w_in:    (D, 4*L*H)   layer-0 input weights scattered into gate-major
                            columns (other layers' columns are zero).
      b_big:   (1, 4*L*H)   all layers' biases in gate-major columns.
      w_big:   (L*H, 4*L*H) block-bidiagonal: row-block r carries W_hh_r into
                            layer r's gates and W_ih_{r+1} into layer r+1's.
      Gate columns are ordered [i_all | f_all | g_all | o_all] (layer-minor);
      i/f/o columns are pre-scaled by 0.5 for the tanh-only sigmoid trick.
    """
    LH = L * H

    # ---- off-critical-path precompute: layer-0 input contribution + biases ----
    add = jnp.dot(x_ref[...], w_in_ref[...],
                  preferred_element_type=jnp.float32) + b_big_ref[...]   # (T*B, 4LH)
    w_big = w_big_ref[...]                                               # (LH, 4LH)

    # Constant lane masks, hoisted out of the wavefront loop.
    lane4 = jax.lax.broadcasted_iota(jnp.int32, (B, 4 * LH), 1)
    is_g = (lane4 >= 2 * LH) & (lane4 < 3 * LH)          # g-gate lanes -> plain tanh
    lane1 = jax.lax.broadcasted_iota(jnp.int32, (B, LH), 1)

    h_all = h0_ref[...]                                   # (B, LH)
    c_all = c0_ref[...]

    seq_parts = []
    # Wavefront over s = t + l; T and L are small and static -> unrolled.
    for s in range(T + L - 1):
        t0 = min(s, T - 1)        # layer-0 addend row (clamped during drain; masked)
        gates = add[t0 * B:(t0 + 1) * B, :] + jnp.dot(
            h_all, w_big, preferred_element_type=jnp.float32)            # (B, 4LH)

        # One EUP push for all layers & gates; sigmoid(x) = 0.5*(1 + tanh(x/2)).
        th = jnp.tanh(gates)
        act = jnp.where(is_g, th, 0.5 * th + 0.5)

        i_a = act[:, 0 * LH:1 * LH]
        f_a = act[:, 1 * LH:2 * LH]
        g_a = act[:, 2 * LH:3 * LH]
        o_a = act[:, 3 * LH:4 * LH]
        c_new = f_a * c_all + i_a * g_a                   # lane-aligned VPU
        h_new = o_a * jnp.tanh(c_new)

        if L - 1 <= s <= T - 1:
            # All layers active: plain update.
            h_all, c_all = h_new, c_new
        else:
            # Ramp-up / drain: only layers l with 0 <= s-l <= T-1 advance.
            lo = max(0, s - (T - 1))
            hi = min(L - 1, s)
            active = (lane1 >= lo * H) & (lane1 < (hi + 1) * H)   # trace-time const
            h_all = jnp.where(active, h_new, h_all)
            c_all = jnp.where(active, c_new, c_all)

        if s >= L - 1:                                    # last layer emitted t = s-(L-1)
            seq_parts.append(h_all[:, (L - 1) * H:LH])

    # ---- head, batched once over all T*B rows ----
    seq = jnp.concatenate(seq_parts, axis=0)              # (T*B, H), time-major
    mu = jnp.mean(seq, axis=-1, keepdims=True)
    var = jnp.mean((seq - mu) ** 2, axis=-1, keepdims=True)
    y = (seq - mu) * jax.lax.rsqrt(var + LN_EPS)
    y = y * ln_g_ref[...] + ln_b_ref[...]
    z = jnp.dot(y, wi_ref[...], preferred_element_type=jnp.float32) + bi_ref[...]
    z = jnp.maximum(z, 0.0)
    o = jnp.dot(z, wo_ref[...], preferred_element_type=jnp.float32) + bo_ref[...]

    out_ref[...] = o                                       # single slab store
    hN_ref[...] = h_all                                    # packed final states
    cN_ref[...] = c_all


def _pack_weights(params, L, H, D):
    """Build the fused, gate-major, sigmoid-prescaled weight blocks."""
    LH = L * H
    G4 = 4 * LH
    w_big = jnp.zeros((LH, G4), jnp.float32)
    w_in_big = jnp.zeros((D, G4), jnp.float32)
    b_big = jnp.zeros((1, G4), jnp.float32)
    for l in range(L):
        w_ih = params["w_ih"][l]          # (d_in, 4H), PyTorch gate order i,f,g,o
        w_hh = params["w_hh"][l]          # (H, 4H)
        b = params["b"][l]                # (1, 4H) = b_ih + b_hh
        for g in range(4):
            col = g * LH + l * H
            src = slice(g * H, (g + 1) * H)
            # recurrent path: h_l -> layer l gates
            w_big = w_big.at[l * H:(l + 1) * H, col:col + H].set(w_hh[:, src])
            b_big = b_big.at[:, col:col + H].set(b[:, src])
            if l == 0:
                w_in_big = w_in_big.at[:, col:col + H].set(w_ih[:, src])
            else:
                # input path: h_{l-1} -> layer l gates
                w_big = w_big.at[(l - 1) * H:l * H, col:col + H].set(w_ih[:, src])
    # Pre-scale i/f/o gate columns by 0.5 (tanh-only sigmoid identity).
    scale = jnp.concatenate([jnp.full((LH,), 0.5), jnp.full((LH,), 0.5),
                             jnp.ones((LH,)), jnp.full((LH,), 0.5)]).astype(jnp.float32)
    w_big = w_big * scale[None, :]
    w_in_big = w_in_big * scale[None, :]
    b_big = b_big * scale[None, :]
    return w_in_big, w_big, b_big


def lstm_multi_modal_forward(x, h0, c0, params):
    """x: (B, T, INPUT_DIM) float32; h0, c0: (NUM_LAYERS, B, HIDDEN).
    Returns (out, (h_n, c_n)) with out: (B, T, OUT_DIM)."""
    B, T, D = x.shape
    L, _, H = h0.shape
    LH = L * H

    # Time-major + flattened input; lane-packed initial states.
    x_flat = jnp.transpose(x, (1, 0, 2)).reshape(T * B, D)
    h_all0 = jnp.transpose(h0, (1, 0, 2)).reshape(B, LH)
    c_all0 = jnp.transpose(c0, (1, 0, 2)).reshape(B, LH)

    w_in_big, w_big, b_big = _pack_weights(params, L, H, D)

    args = [x_flat, h_all0, c_all0, w_in_big, b_big, w_big,
            params["ln_g"], params["ln_b"],
            params["wi"], params["bi"], params["wo"], params["bo"]]

    vmem_spec = pl.BlockSpec(memory_space=pltpu.MemorySpace.VMEM)
    out_shape = [
        jax.ShapeDtypeStruct((T * B, OUT_DIM), jnp.float32),
        jax.ShapeDtypeStruct((B, LH), jnp.float32),
        jax.ShapeDtypeStruct((B, LH), jnp.float32),
    ]

    kernel = functools.partial(_lstm_mm_kernel, T, B, L, H)
    out_flat, h_fin, c_fin = pl.pallas_call(
        kernel,
        out_shape=out_shape,
        in_specs=[vmem_spec] * len(args),
        out_specs=[vmem_spec] * 3,
    )(*args)

    out = out_flat.reshape(T, B, OUT_DIM).transpose(1, 0, 2)    # (B, T, OUT)
    h_n = h_fin.reshape(B, L, H).transpose(1, 0, 2)             # (L, B, H)
    c_n = c_fin.reshape(B, L, H).transpose(1, 0, 2)
    return out, (h_n, c_n)


def make_params(key):
    """Deterministic parameter init (PyTorch-like uniform(-1/sqrt(H), 1/sqrt(H)))."""
    k = 1.0 / jnp.sqrt(jnp.float32(HIDDEN))
    params = {"w_ih": [], "w_hh": [], "b": []}
    keys = jax.random.split(key, 4 * NUM_LAYERS + 6)
    idx = 0
    for l in range(NUM_LAYERS):
        d_in = INPUT_DIM if l == 0 else HIDDEN
        # stored transposed vs. PyTorch so matmuls are inp @ W directly
        params["w_ih"].append(jax.random.uniform(keys[idx], (d_in, 4 * HIDDEN),
                                                 jnp.float32, -k, k)); idx += 1
        params["w_hh"].append(jax.random.uniform(keys[idx], (HIDDEN, 4 * HIDDEN),
                                                 jnp.float32, -k, k)); idx += 1
        b_ih = jax.random.uniform(keys[idx], (1, 4 * HIDDEN), jnp.float32, -k, k); idx += 1
        b_hh = jax.random.uniform(keys[idx], (1, 4 * HIDDEN), jnp.float32, -k, k); idx += 1
        params["b"].append(b_ih + b_hh)
    params["ln_g"] = jnp.ones((1, HIDDEN), jnp.float32)
    params["ln_b"] = jnp.zeros((1, HIDDEN), jnp.float32)
    params["wi"] = jax.random.uniform(keys[idx], (HIDDEN, HIDDEN), jnp.float32, -k, k); idx += 1
    params["bi"] = jax.random.uniform(keys[idx], (1, HIDDEN), jnp.float32, -k, k); idx += 1
    params["wo"] = jax.random.uniform(keys[idx], (HIDDEN, OUT_DIM), jnp.float32, -k, k); idx += 1
    params["bo"] = jax.random.uniform(keys[idx], (1, OUT_DIM), jnp.float32, -k, k); idx += 1
    return params


def ref_forward(x, h0, c0, p):
    """Pure-JAX reference of the same forward pass (for a correctness check)."""
    def step(carry, xt):
        h, c = carry
        inp = xt
        hs, cs = [], []
        for l in range(NUM_LAYERS):
            g = inp @ p["w_ih"][l] + h[l] @ p["w_hh"][l] + p["b"][l]
            i = jax.nn.sigmoid(g[:, :HIDDEN])
            f = jax.nn.sigmoid(g[:, HIDDEN:2 * HIDDEN])
            gg = jnp.tanh(g[:, 2 * HIDDEN:3 * HIDDEN])
            o = jax.nn.sigmoid(g[:, 3 * HIDDEN:])
            cn = f * c[l] + i * gg
            hn = o * jnp.tanh(cn)
            hs.append(hn); cs.append(cn)
            inp = hn
        return (jnp.stack(hs), jnp.stack(cs)), inp

    (h_n, c_n), seq = jax.lax.scan(step, (h0, c0), jnp.transpose(x, (1, 0, 2)))
    seq = jnp.transpose(seq, (1, 0, 2))
    mu = jnp.mean(seq, axis=-1, keepdims=True)
    var = jnp.mean((seq - mu) ** 2, axis=-1, keepdims=True)
    y = (seq - mu) * jax.lax.rsqrt(var + LN_EPS) * p["ln_g"] + p["ln_b"]
    z = jnp.maximum(y @ p["wi"] + p["bi"], 0.0)
    return z @ p["wo"] + p["bo"], (h_n, c_n)


if __name__ == "__main__":
    B, T = 2, 8
    key = jax.random.PRNGKey(0)
    kx, kp, kh, kc = jax.random.split(key, 4)
    x = jax.random.normal(kx, (B, T, INPUT_DIM), jnp.float32)
    h0 = 0.1 * jax.random.normal(kh, (NUM_LAYERS, B, HIDDEN), jnp.float32)
    c0 = 0.1 * jax.random.normal(kc, (NUM_LAYERS, B, HIDDEN), jnp.float32)
    params = make_params(kp)

    out, (h_n, c_n) = lstm_multi_modal_forward(x, h0, c0, params)
    jax.block_until_ready((out, h_n, c_n))

    ref_out, (ref_h, ref_c) = ref_forward(x, h0, c0, params)
    assert out.shape == (B, T, OUT_DIM)
    assert h_n.shape == (NUM_LAYERS, B, HIDDEN) and c_n.shape == (NUM_LAYERS, B, HIDDEN)
    assert jnp.allclose(out, ref_out, atol=1e-4, rtol=1e-4)
    assert jnp.allclose(h_n, ref_h, atol=1e-4, rtol=1e-4)
    assert jnp.allclose(c_n, ref_c, atol=1e-4, rtol=1e-4)

    print("KERNEL_OK")
</pallas_src>

<mosaic_0001>
module attributes {stable_mosaic.version = 11 : i64} {
  func.func @_lstm_mm_kernel(%arg0: memref<16x8xf32, #tpu.memory_space<vmem>>, %arg1: memref<2x64xf32, #tpu.memory_space<vmem>>, %arg2: memref<2x64xf32, #tpu.memory_space<vmem>>, %arg3: memref<8x256xf32, #tpu.memory_space<vmem>>, %arg4: memref<1x256xf32, #tpu.memory_space<vmem>>, %arg5: memref<64x256xf32, #tpu.memory_space<vmem>>, %arg6: memref<1x32xf32, #tpu.memory_space<vmem>>, %arg7: memref<1x32xf32, #tpu.memory_space<vmem>>, %arg8: memref<32x32xf32, #tpu.memory_space<vmem>>, %arg9: memref<1x32xf32, #tpu.memory_space<vmem>>, %arg10: memref<32x32xf32, #tpu.memory_space<vmem>>, %arg11: memref<1x32xf32, #tpu.memory_space<vmem>>, %arg12: memref<16x32xf32, #tpu.memory_space<vmem>>, %arg13: memref<2x64xf32, #tpu.memory_space<vmem>>, %arg14: memref<2x64xf32, #tpu.memory_space<vmem>>) attributes {dimension_semantics = [], scalar_prefetch = 0 : i64, scratch_operands = 0 : i64, tpu.core_type = #tpu.core_type<tc>} {
    %c0 = arith.constant 0 : index
    %c0_0 = arith.constant 0 : index
    %0 = vector.load %arg0[%c0, %c0_0] : memref<16x8xf32, #tpu.memory_space<vmem>>, vector<16x8xf32>
    %c0_1 = arith.constant 0 : index
    %c0_2 = arith.constant 0 : index
    %1 = vector.load %arg3[%c0_1, %c0_2] : memref<8x256xf32, #tpu.memory_space<vmem>>, vector<8x256xf32>
    %cst = arith.constant dense<0.000000e+00> : vector<16x256xf32>
    %2 = tpu.matmul %0, %1, %cst {dimension_numbers = #tpu.dot_dimension_numbers<[1], [0], [0], [1], [0, 0, 1, 1], [], []>} : vector<16x8xf32>, vector<8x256xf32>, vector<16x256xf32> -> vector<16x256xf32>
    %c0_3 = arith.constant 0 : index
    %c0_4 = arith.constant 0 : index
    %3 = vector.load %arg4[%c0_3, %c0_4] : memref<1x256xf32, #tpu.memory_space<vmem>>, vector<1x256xf32>
    %4 = vector.broadcast %3 : vector<1x256xf32> to vector<16x256xf32>
    %5 = arith.addf %2, %4 : vector<16x256xf32>
    %c0_5 = arith.constant 0 : index
    %c0_6 = arith.constant 0 : index
    %6 = vector.load %arg5[%c0_5, %c0_6] : memref<64x256xf32, #tpu.memory_space<vmem>>, vector<64x256xf32>
    %7 = tpu.iota {dimensions = array<i32: 1>} : vector<2x256xi32>
    %c128_i32 = arith.constant 128 : i32
    %8 = vector.broadcast %c128_i32 : i32 to vector<2x256xi32>
    %9 = arith.cmpi sge, %7, %8 : vector<2x256xi32>
    %c192_i32 = arith.constant 192 : i32
    %10 = vector.broadcast %c192_i32 : i32 to vector<2x256xi32>
    %11 = arith.cmpi slt, %7, %10 : vector<2x256xi32>
    %12 = arith.andi %9, %11 : vector<2x256xi1>
    %13 = tpu.iota {dimensions = array<i32: 1>} : vector<2x64xi32>
    %c0_7 = arith.constant 0 : index
    %c0_8 = arith.constant 0 : index
    %14 = vector.load %arg1[%c0_7, %c0_8] : memref<2x64xf32, #tpu.memory_space<vmem>>, vector<2x64xf32>
    %c0_9 = arith.constant 0 : index
    %c0_10 = arith.constant 0 : index
    %15 = vector.load %arg2[%c0_9, %c0_10] : memref<2x64xf32, #tpu.memory_space<vmem>>, vector<2x64xf32>
    %16 = vector.extract_strided_slice %5 {offsets = [0, 0], sizes = [2, 256], strides = [1, 1]} : vector<16x256xf32> to vector<2x256xf32>
    %cst_11 = arith.constant dense<0.000000e+00> : vector<2x256xf32>
    %17 = tpu.matmul %14, %6, %cst_11 {dimension_numbers = #tpu.dot_dimension_numbers<[1], [0], [0], [1], [0, 0, 1, 1], [], []>} : vector<2x64xf32>, vector<64x256xf32>, vector<2x256xf32> -> vector<2x256xf32>
    %18 = arith.addf %16, %17 : vector<2x256xf32>
    %19 = math.tanh %18 : vector<2x256xf32>
    %cst_12 = arith.constant 5.000000e-01 : f32
    %20 = vector.broadcast %cst_12 : f32 to vector<2x256xf32>
    %21 = arith.mulf %20, %19 : vector<2x256xf32>
    %cst_13 = arith.constant 5.000000e-01 : f32
    %22 = vector.broadcast %cst_13 : f32 to vector<2x256xf32>
    %23 = arith.addf %21, %22 : vector<2x256xf32>
    %24 = arith.select %12, %19, %23 : vector<2x256xi1>, vector<2x256xf32>
    %25 = vector.extract_strided_slice %24 {offsets = [0, 0], sizes = [2, 64], strides = [1, 1]} : vector<2x256xf32> to vector<2x64xf32>
    %26 = vector.extract_strided_slice %24 {offsets = [0, 64], sizes = [2, 64], strides = [1, 1]} : vector<2x256xf32> to vector<2x64xf32>
    %27 = vector.extract_strided_slice %24 {offsets = [0, 128], sizes = [2, 64], strides = [1, 1]} : vector<2x256xf32> to vector<2x64xf32>
    %28 = vector.extract_strided_slice %24 {offsets = [0, 192], sizes = [2, 64], strides = [1, 1]} : vector<2x256xf32> to vector<2x64xf32>
    %29 = arith.mulf %26, %15 : vector<2x64xf32>
    %30 = arith.mulf %25, %27 : vector<2x64xf32>
    %31 = arith.addf %29, %30 : vector<2x64xf32>
    %32 = math.tanh %31 : vector<2x64xf32>
    %33 = arith.mulf %28, %32 : vector<2x64xf32>
    %c0_i32 = arith.constant 0 : i32
    %34 = vector.broadcast %c0_i32 : i32 to vector<2x64xi32>
    %35 = arith.cmpi sge, %13, %34 : vector<2x64xi32>
    %c32_i32 = arith.constant 32 : i32
    %36 = vector.broadcast %c32_i32 : i32 to vector<2x64xi32>
    %37 = arith.cmpi slt, %13, %36 : vector<2x64xi32>
    %38 = arith.andi %35, %37 : vector<2x64xi1>
    %39 = arith.select %38, %33, %14 : vector<2x64xi1>, vector<2x64xf32>
    %40 = arith.select %38, %31, %15 : vector<2x64xi1>, vector<2x64xf32>
    %41 = vector.extract_strided_slice %5 {offsets = [2, 0], sizes = [2, 256], strides = [1, 1]} : vector<16x256xf32> to vector<2x256xf32>
    %cst_14 = arith.constant dense<0.000000e+00> : vector<2x256xf32>
    %42 = tpu.matmul %39, %6, %cst_14 {dimension_numbers = #tpu.dot_dimension_numbers<[1], [0], [0], [1], [0, 0, 1, 1], [], []>} : vector<2x64xf32>, vector<64x256xf32>, vector<2x256xf32> -> vector<2x256xf32>
    %43 = arith.addf %41, %42 : vector<2x256xf32>
    %44 = math.tanh %43 : vector<2x256xf32>
    %cst_15 = arith.constant 5.000000e-01 : f32
    %45 = vector.broadcast %cst_15 : f32 to vector<2x256xf32>
    %46 = arith.mulf %45, %44 : vector<2x256xf32>
    %cst_16 = arith.constant 5.000000e-01 : f32
    %47 = vector.broadcast %cst_16 : f32 to vector<2x256xf32>
    %48 = arith.addf %46, %47 : vector<2x256xf32>
    %49 = arith.select %12, %44, %48 : vector<2x256xi1>, vector<2x256xf32>
    %50 = vector.extract_strided_slice %49 {offsets = [0, 0], sizes = [2, 64], strides = [1, 1]} : vector<2x256xf32> to vector<2x64xf32>
    %51 = vector.extract_strided_slice %49 {offsets = [0, 64], sizes = [2, 64], strides = [1, 1]} : vector<2x256xf32> to vector<2x64xf32>
    %52 = vector.extract_strided_slice %49 {offsets = [0, 128], sizes = [2, 64], strides = [1, 1]} : vector<2x256xf32> to vector<2x64xf32>
    %53 = vector.extract_strided_slice %49 {offsets = [0, 192], sizes = [2, 64], strides = [1, 1]} : vector<2x256xf32> to vector<2x64xf32>
    %54 = arith.mulf %51, %40 : vector<2x64xf32>
    %55 = arith.mulf %50, %52 : vector<2x64xf32>
    %56 = arith.addf %54, %55 : vector<2x64xf32>
    %57 = math.tanh %56 : vector<2x64xf32>
    %58 = arith.mulf %53, %57 : vector<2x64xf32>
    %59 = vector.extract_strided_slice %58 {offsets = [0, 32], sizes = [2, 32], strides = [1, 1]} : vector<2x64xf32> to vector<2x32xf32>
    %60 = vector.extract_strided_slice %5 {offsets = [4, 0], sizes = [2, 256], strides = [1, 1]} : vector<16x256xf32> to vector<2x256xf32>
    %cst_17 = arith.constant dense<0.000000e+00> : vector<2x256xf32>
    %61 = tpu.matmul %58, %6, %cst_17 {dimension_numbers = #tpu.dot_dimension_numbers<[1], [0], [0], [1], [0, 0, 1, 1], [], []>} : vector<2x64xf32>, vector<64x256xf32>, vector<2x256xf32> -> vector<2x256xf32>
    %62 = arith.addf %60, %61 : vector<2x256xf32>
    %63 = math.tanh %62 : vector<2x256xf32>
    %cst_18 = arith.constant 5.000000e-01 : f32
    %64 = vector.broadcast %cst_18 : f32 to vector<2x256xf32>
    %65 = arith.mulf %64, %63 : vector<2x256xf32>
    %cst_19 = arith.constant 5.000000e-01 : f32
    %66 = vector.broadcast %cst_19 : f32 to vector<2x256xf32>
    %67 = arith.addf %65, %66 : vector<2x256xf32>
    %68 = arith.select %12, %63, %67 : vector<2x256xi1>, vector<2x256xf32>
    %69 = vector.extract_strided_slice %68 {offsets = [0, 0], sizes = [2, 64], strides = [1, 1]} : vector<2x256xf32> to vector<2x64xf32>
    %70 = vector.extract_strided_slice %68 {offsets = [0, 64], sizes = [2, 64], strides = [1, 1]} : vector<2x256xf32> to vector<2x64xf32>
    %71 = vector.extract_strided_slice %68 {offsets = [0, 128], sizes = [2, 64], strides = [1, 1]} : vector<2x256xf32> to vector<2x64xf32>
    %72 = vector.extract_strided_slice %68 {offsets = [0, 192], sizes = [2, 64], strides = [1, 1]} : vector<2x256xf32> to vector<2x64xf32>
    %73 = arith.mulf %70, %56 : vector<2x64xf32>
    %74 = arith.mulf %69, %71 : vector<2x64xf32>
    %75 = arith.addf %73, %74 : vector<2x64xf32>
    %76 = math.tanh %75 : vector<2x64xf32>
    %77 = arith.mulf %72, %76 : vector<2x64xf32>
    %78 = vector.extract_strided_slice %77 {offsets = [0, 32], sizes = [2, 32], strides = [1, 1]} : vector<2x64xf32> to vector<2x32xf32>
    %79 = vector.extract_strided_slice %5 {offsets = [6, 0], sizes = [2, 256], strides = [1, 1]} : vector<16x256xf32> to vector<2x256xf32>
    %cst_20 = arith.constant dense<0.000000e+00> : vector<2x256xf32>
    %80 = tpu.matmul %77, %6, %cst_20 {dimension_numbers = #tpu.dot_dimension_numbers<[1], [0], [0], [1], [0, 0, 1, 1], [], []>} : vector<2x64xf32>, vector<64x256xf32>, vector<2x256xf32> -> vector<2x256xf32>
    %81 = arith.addf %79, %80 : vector<2x256xf32>
    %82 = math.tanh %81 : vector<2x256xf32>
    %cst_21 = arith.constant 5.000000e-01 : f32
    %83 = vector.broadcast %cst_21 : f32 to vector<2x256xf32>
    %84 = arith.mulf %83, %82 : vector<2x256xf32>
    %cst_22 = arith.constant 5.000000e-01 : f32
    %85 = vector.broadcast %cst_22 : f32 to vector<2x256xf32>
    %86 = arith.addf %84, %85 : vector<2x256xf32>
    %87 = arith.select %12, %82, %86 : vector<2x256xi1>, vector<2x256xf32>
    %88 = vector.extract_strided_slice %87 {offsets = [0, 0], sizes = [2, 64], strides = [1, 1]} : vector<2x256xf32> to vector<2x64xf32>
    %89 = vector.extract_strided_slice %87 {offsets = [0, 64], sizes = [2, 64], strides = [1, 1]} : vector<2x256xf32> to vector<2x64xf32>
    %90 = vector.extract_strided_slice %87 {offsets = [0, 128], sizes = [2, 64], strides = [1, 1]} : vector<2x256xf32> to vector<2x64xf32>
    %91 = vector.extract_strided_slice %87 {offsets = [0, 192], sizes = [2, 64], strides = [1, 1]} : vector<2x256xf32> to vector<2x64xf32>
    %92 = arith.mulf %89, %75 : vector<2x64xf32>
    %93 = arith.mulf %88, %90 : vector<2x64xf32>
    %94 = arith.addf %92, %93 : vector<2x64xf32>
    %95 = math.tanh %94 : vector<2x64xf32>
    %96 = arith.mulf %91, %95 : vector<2x64xf32>
    %97 = vector.extract_strided_slice %96 {offsets = [0, 32], sizes = [2, 32], strides = [1, 1]} : vector<2x64xf32> to vector<2x32xf32>
    %98 = vector.extract_strided_slice %5 {offsets = [8, 0], sizes = [2, 256], strides = [1, 1]} : vector<16x256xf32> to vector<2x256xf32>
    %cst_23 = arith.constant dense<0.000000e+00> : vector<2x256xf32>
    %99 = tpu.matmul %96, %6, %cst_23 {dimension_numbers = #tpu.dot_dimension_numbers<[1], [0], [0], [1], [0, 0, 1, 1], [], []>} : vector<2x64xf32>, vector<64x256xf32>, vector<2x256xf32> -> vector<2x256xf32>
    %100 = arith.addf %98, %99 : vector<2x256xf32>
    %101 = math.tanh %100 : vector<2x256xf32>
    %cst_24 = arith.constant 5.000000e-01 : f32
    %102 = vector.broadcast %cst_24 : f32 to vector<2x256xf32>
    %103 = arith.mulf %102, %101 : vector<2x256xf32>
    %cst_25 = arith.constant 5.000000e-01 : f32
    %104 = vector.broadcast %cst_25 : f32 to vector<2x256xf32>
    %105 = arith.addf %103, %104 : vector<2x256xf32>
    %106 = arith.select %12, %101, %105 : vector<2x256xi1>, vector<2x256xf32>
    %107 = vector.extract_strided_slice %106 {offsets = [0, 0], sizes = [2, 64], strides = [1, 1]} : vector<2x256xf32> to vector<2x64xf32>
    %108 = vector.extract_strided_slice %106 {offsets = [0, 64], sizes = [2, 64], strides = [1, 1]} : vector<2x256xf32> to vector<2x64xf32>
    %109 = vector.extract_strided_slice %106 {offsets = [0, 128], sizes = [2, 64], strides = [1, 1]} : vector<2x256xf32> to vector<2x64xf32>
    %110 = vector.extract_strided_slice %106 {offsets = [0, 192], sizes = [2, 64], strides = [1, 1]} : vector<2x256xf32> to vector<2x64xf32>
    %111 = arith.mulf %108, %94 : vector<2x64xf32>
    %112 = arith.mulf %107, %109 : vector<2x64xf32>
    %113 = arith.addf %111, %112 : vector<2x64xf32>
    %114 = math.tanh %113 : vector<2x64xf32>
    %115 = arith.mulf %110, %114 : vector<2x64xf32>
    %116 = vector.extract_strided_slice %115 {offsets = [0, 32], sizes = [2, 32], strides = [1, 1]} : vector<2x64xf32> to vector<2x32xf32>
    %117 = vector.extract_strided_slice %5 {offsets = [10, 0], sizes = [2, 256], strides = [1, 1]} : vector<16x256xf32> to vector<2x256xf32>
    %cst_26 = arith.constant dense<0.000000e+00> : vector<2x256xf32>
    %118 = tpu.matmul %115, %6, %cst_26 {dimension_numbers = #tpu.dot_dimension_numbers<[1], [0], [0], [1], [0, 0, 1, 1], [], []>} : vector<2x64xf32>, vector<64x256xf32>, vector<2x256xf32> -> vector<2x256xf32>
    %119 = arith.addf %117, %118 : vector<2x256xf32>
    %120 = math.tanh %119 : vector<2x256xf32>
    %cst_27 = arith.constant 5.000000e-01 : f32
    %121 = vector.broadcast %cst_27 : f32 to vector<2x256xf32>
    %122 = arith.mulf %121, %120 : vector<2x256xf32>
    %cst_28 = arith.constant 5.000000e-01 : f32
    %123 = vector.broadcast %cst_28 : f32 to vector<2x256xf32>
    %124 = arith.addf %122, %123 : vector<2x256xf32>
    %125 = arith.select %12, %120, %124 : vector<2x256xi1>, vector<2x256xf32>
    %126 = vector.extract_strided_slice %125 {offsets = [0, 0], sizes = [2, 64], strides = [1, 1]} : vector<2x256xf32> to vector<2x64xf32>
    %127 = vector.extract_strided_slice %125 {offsets = [0, 64], sizes = [2, 64], strides = [1, 1]} : vector<2x256xf32> to vector<2x64xf32>
    %128 = vector.extract_strided_slice %125 {offsets = [0, 128], sizes = [2, 64], strides = [1, 1]} : vector<2x256xf32> to vector<2x64xf32>
    %129 = vector.extract_strided_slice %125 {offsets = [0, 192], sizes = [2, 64], strides = [1, 1]} : vector<2x256xf32> to vector<2x64xf32>
    %130 = arith.mulf %127, %113 : vector<2x64xf32>
    %131 = arith.mulf %126, %128 : vector<2x64xf32>
    %132 = arith.addf %130, %131 : vector<2x64xf32>
    %133 = math.tanh %132 : vector<2x64xf32>
    %134 = arith.mulf %129, %133 : vector<2x64xf32>
    %135 = vector.extract_strided_slice %134 {offsets = [0, 32], sizes = [2, 32], strides = [1, 1]} : vector<2x64xf32> to vector<2x32xf32>
    %136 = vector.extract_strided_slice %5 {offsets = [12, 0], sizes = [2, 256], strides = [1, 1]} : vector<16x256xf32> to vector<2x256xf32>
    %cst_29 = arith.constant dense<0.000000e+00> : vector<2x256xf32>
    %137 = tpu.matmul %134, %6, %cst_29 {dimension_numbers = #tpu.dot_dimension_numbers<[1], [0], [0], [1], [0, 0, 1, 1], [], []>} : vector<2x64xf32>, vector<64x256xf32>, vector<2x256xf32> -> vector<2x256xf32>
    %138 = arith.addf %136, %137 : vector<2x256xf32>
    %139 = math.tanh %138 : vector<2x256xf32>
    %cst_30 = arith.constant 5.000000e-01 : f32
    %140 = vector.broadcast %cst_30 : f32 to vector<2x256xf32>
    %141 = arith.mulf %140, %139 : vector<2x256xf32>
    %cst_31 = arith.constant 5.000000e-01 : f32
    %142 = vector.broadcast %cst_31 : f32 to vector<2x256xf32>
    %143 = arith.addf %141, %142 : vector<2x256xf32>
    %144 = arith.select %12, %139, %143 : vector<2x256xi1>, vector<2x256xf32>
    %145 = vector.extract_strided_slice %144 {offsets = [0, 0], sizes = [2, 64], strides = [1, 1]} : vector<2x256xf32> to vector<2x64xf32>
    %146 = vector.extract_strided_slice %144 {offsets = [0, 64], sizes = [2, 64], strides = [1, 1]} : vector<2x256xf32> to vector<2x64xf32>
    %147 = vector.extract_strided_slice %144 {offsets = [0, 128], sizes = [2, 64], strides = [1, 1]} : vector<2x256xf32> to vector<2x64xf32>
    %148 = vector.extract_strided_slice %144 {offsets = [0, 192], sizes = [2, 64], strides = [1, 1]} : vector<2x256xf32> to vector<2x64xf32>
    %149 = arith.mulf %146, %132 : vector<2x64xf32>
    %150 = arith.mulf %145, %147 : vector<2x64xf32>
    %151 = arith.addf %149, %150 : vector<2x64xf32>
    %152 = math.tanh %151 : vector<2x64xf32>
    %153 = arith.mulf %148, %152 : vector<2x64xf32>
    %154 = vector.extract_strided_slice %153 {offsets = [0, 32], sizes = [2, 32], strides = [1, 1]} : vector<2x64xf32> to vector<2x32xf32>
    %155 = vector.extract_strided_slice %5 {offsets = [14, 0], sizes = [2, 256], strides = [1, 1]} : vector<16x256xf32> to vector<2x256xf32>
    %cst_32 = arith.constant dense<0.000000e+00> : vector<2x256xf32>
    %156 = tpu.matmul %153, %6, %cst_32 {dimension_numbers = #tpu.dot_dimension_numbers<[1], [0], [0], [1], [0, 0, 1, 1], [], []>} : vector<2x64xf32>, vector<64x256xf32>, vector<2x256xf32> -> vector<2x256xf32>
    %157 = arith.addf %155, %156 : vector<2x256xf32>
    %158 = math.tanh %157 : vector<2x256xf32>
    %cst_33 = arith.constant 5.000000e-01 : f32
    %159 = vector.broadcast %cst_33 : f32 to vector<2x256xf32>
    %160 = arith.mulf %159, %158 : vector<2x256xf32>
    %cst_34 = arith.constant 5.000000e-01 : f32
    %161 = vector.broadcast %cst_34 : f32 to vector<2x256xf32>
    %162 = arith.addf %160, %161 : vector<2x256xf32>
    %163 = arith.select %12, %158, %162 : vector<2x256xi1>, vector<2x256xf32>
    %164 = vector.extract_strided_slice %163 {offsets = [0, 0], sizes = [2, 64], strides = [1, 1]} : vector<2x256xf32> to vector<2x64xf32>
    %165 = vector.extract_strided_slice %163 {offsets = [0, 64], sizes = [2, 64], strides = [1, 1]} : vector<2x256xf32> to vector<2x64xf32>
    %166 = vector.extract_strided_slice %163 {offsets = [0, 128], sizes = [2, 64], strides = [1, 1]} : vector<2x256xf32> to vector<2x64xf32>
    %167 = vector.extract_strided_slice %163 {offsets = [0, 192], sizes = [2, 64], strides = [1, 1]} : vector<2x256xf32> to vector<2x64xf32>
    %168 = arith.mulf %165, %151 : vector<2x64xf32>
    %169 = arith.mulf %164, %166 : vector<2x64xf32>
    %170 = arith.addf %168, %169 : vector<2x64xf32>
    %171 = math.tanh %170 : vector<2x64xf32>
    %172 = arith.mulf %167, %171 : vector<2x64xf32>
    %173 = vector.extract_strided_slice %172 {offsets = [0, 32], sizes = [2, 32], strides = [1, 1]} : vector<2x64xf32> to vector<2x32xf32>
    %174 = vector.extract_strided_slice %5 {offsets = [14, 0], sizes = [2, 256], strides = [1, 1]} : vector<16x256xf32> to vector<2x256xf32>
    %cst_35 = arith.constant dense<0.000000e+00> : vector<2x256xf32>
    %175 = tpu.matmul %172, %6, %cst_35 {dimension_numbers = #tpu.dot_dimension_numbers<[1], [0], [0], [1], [0, 0, 1, 1], [], []>} : vector<2x64xf32>, vector<64x256xf32>, vector<2x256xf32> -> vector<2x256xf32>
    %176 = arith.addf %174, %175 : vector<2x256xf32>
    %177 = math.tanh %176 : vector<2x256xf32>
    %cst_36 = arith.constant 5.000000e-01 : f32
    %178 = vector.broadcast %cst_36 : f32 to vector<2x256xf32>
    %179 = arith.mulf %178, %177 : vector<2x256xf32>
    %cst_37 = arith.constant 5.000000e-01 : f32
    %180 = vector.broadcast %cst_37 : f32 to vector<2x256xf32>
    %181 = arith.addf %179, %180 : vector<2x256xf32>
    %182 = arith.select %12, %177, %181 : vector<2x256xi1>, vector<2x256xf32>
    %183 = vector.extract_strided_slice %182 {offsets = [0, 0], sizes = [2, 64], strides = [1, 1]} : vector<2x256xf32> to vector<2x64xf32>
    %184 = vector.extract_strided_slice %182 {offsets = [0, 64], sizes = [2, 64], strides = [1, 1]} : vector<2x256xf32> to vector<2x64xf32>
    %185 = vector.extract_strided_slice %182 {offsets = [0, 128], sizes = [2, 64], strides = [1, 1]} : vector<2x256xf32> to vector<2x64xf32>
    %186 = vector.extract_strided_slice %182 {offsets = [0, 192], sizes = [2, 64], strides = [1, 1]} : vector<2x256xf32> to vector<2x64xf32>
    %187 = arith.mulf %184, %170 : vector<2x64xf32>
    %188 = arith.mulf %183, %185 : vector<2x64xf32>
    %189 = arith.addf %187, %188 : vector<2x64xf32>
    %190 = math.tanh %189 : vector<2x64xf32>
    %191 = arith.mulf %186, %190 : vector<2x64xf32>
    %c32_i32_38 = arith.constant 32 : i32
    %192 = vector.broadcast %c32_i32_38 : i32 to vector<2x64xi32>
    %193 = arith.cmpi sge, %13, %192 : vector<2x64xi32>
    %c64_i32 = arith.constant 64 : i32
    %194 = vector.broadcast %c64_i32 : i32 to vector<2x64xi32>
    %195 = arith.cmpi slt, %13, %194 : vector<2x64xi32>
    %196 = arith.andi %193, %195 : vector<2x64xi1>
    %197 = arith.select %196, %191, %172 : vector<2x64xi1>, vector<2x64xf32>
    %198 = arith.select %196, %189, %170 : vector<2x64xi1>, vector<2x64xf32>
    %199 = vector.extract_strided_slice %197 {offsets = [0, 32], sizes = [2, 32], strides = [1, 1]} : vector<2x64xf32> to vector<2x32xf32>
    %200 = tpu.concatenate %59, %78, %97, %116, %135, %154, %173, %199 in 0 : vector<2x32xf32>, vector<2x32xf32>, vector<2x32xf32>, vector<2x32xf32>, vector<2x32xf32>, vector<2x32xf32>, vector<2x32xf32>, vector<2x32xf32> -> vector<16x32xf32>
    %cst_39 = arith.constant dense<0.000000e+00> : vector<16xf32>
    %201 = vector.multi_reduction <add>, %200, %cst_39 [1] : vector<16x32xf32> to vector<16xf32>
    %202 = vector.shape_cast %201 : vector<16xf32> to vector<16x1xf32>
    %cst_40 = arith.constant 3.200000e+01 : f32
    %203 = vector.broadcast %cst_40 : f32 to vector<16x1xf32>
    %204 = arith.divf %202, %203 : vector<16x1xf32>
    %205 = vector.broadcast %204 : vector<16x1xf32> to vector<16x32xf32>
    %206 = arith.subf %200, %205 : vector<16x32xf32>
    %207 = arith.mulf %206, %206 : vector<16x32xf32>
    %cst_41 = arith.constant dense<0.000000e+00> : vector<16xf32>
    %208 = vector.multi_reduction <add>, %207, %cst_41 [1] : vector<16x32xf32> to vector<16xf32>
    %209 = vector.shape_cast %208 : vector<16xf32> to vector<16x1xf32>
    %cst_42 = arith.constant 3.200000e+01 : f32
    %210 = vector.broadcast %cst_42 : f32 to vector<16x1xf32>
    %211 = arith.divf %209, %210 : vector<16x1xf32>
    %212 = vector.broadcast %204 : vector<16x1xf32> to vector<16x32xf32>
    %213 = arith.subf %200, %212 : vector<16x32xf32>
    %cst_43 = arith.constant 9.99999974E-6 : f32
    %214 = vector.broadcast %cst_43 : f32 to vector<16x1xf32>
    %215 = arith.addf %211, %214 : vector<16x1xf32>
    %216 = math.rsqrt %215 : vector<16x1xf32>
    %217 = vector.broadcast %216 : vector<16x1xf32> to vector<16x32xf32>
    %218 = arith.mulf %213, %217 : vector<16x32xf32>
    %c0_44 = arith.constant 0 : index
    %c0_45 = arith.constant 0 : index
    %219 = vector.load %arg6[%c0_44, %c0_45] : memref<1x32xf32, #tpu.memory_space<vmem>>, vector<1x32xf32>
    %220 = vector.broadcast %219 : vector<1x32xf32> to vector<16x32xf32>
    %221 = arith.mulf %218, %220 : vector<16x32xf32>
    %c0_46 = arith.constant 0 : index
    %c0_47 = arith.constant 0 : index
    %222 = vector.load %arg7[%c0_46, %c0_47] : memref<1x32xf32, #tpu.memory_space<vmem>>, vector<1x32xf32>
    %223 = vector.broadcast %222 : vector<1x32xf32> to vector<16x32xf32>
    %224 = arith.addf %221, %223 : vector<16x32xf32>
    %c0_48 = arith.constant 0 : index
    %c0_49 = arith.constant 0 : index
    %225 = vector.load %arg8[%c0_48, %c0_49] : memref<32x32xf32, #tpu.memory_space<vmem>>, vector<32x32xf32>
    %cst_50 = arith.constant dense<0.000000e+00> : vector<16x32xf32>
    %226 = tpu.matmul %224, %225, %cst_50 {dimension_numbers = #tpu.dot_dimension_numbers<[1], [0], [0], [1], [0, 0, 1, 1], [], []>} : vector<16x32xf32>, vector<32x32xf32>, vector<16x32xf32> -> vector<16x32xf32>
    %c0_51 = arith.constant 0 : index
    %c0_52 = arith.constant 0 : index
    %227 = vector.load %arg9[%c0_51, %c0_52] : memref<1x32xf32, #tpu.memory_space<vmem>>, vector<1x32xf32>
    %228 = vector.broadcast %227 : vector<1x32xf32> to vector<16x32xf32>
    %229 = arith.addf %226, %228 : vector<16x32xf32>
    %cst_53 = arith.constant 0.000000e+00 : f32
    %230 = vector.broadcast %cst_53 : f32 to vector<16x32xf32>
    %231 = arith.maximumf %229, %230 : vector<16x32xf32>
    %c0_54 = arith.constant 0 : index
    %c0_55 = arith.constant 0 : index
    %232 = vector.load %arg10[%c0_54, %c0_55] : memref<32x32xf32, #tpu.memory_space<vmem>>, vector<32x32xf32>
    %cst_56 = arith.constant dense<0.000000e+00> : vector<16x32xf32>
    %233 = tpu.matmul %231, %232, %cst_56 {dimension_numbers = #tpu.dot_dimension_numbers<[1], [0], [0], [1], [0, 0, 1, 1], [], []>} : vector<16x32xf32>, vector<32x32xf32>, vector<16x32xf32> -> vector<16x32xf32>
    %c0_57 = arith.constant 0 : index
    %c0_58 = arith.constant 0 : index
    %234 = vector.load %arg11[%c0_57, %c0_58] : memref<1x32xf32, #tpu.memory_space<vmem>>, vector<1x32xf32>
    %235 = vector.broadcast %234 : vector<1x32xf32> to vector<16x32xf32>
    %236 = arith.addf %233, %235 : vector<16x32xf32>
    %c0_59 = arith.constant 0 : index
    %c0_60 = arith.constant 0 : index
    %237 = vector.load %arg12[%c0_59, %c0_60] : memref<16x32xf32, #tpu.memory_space<vmem>>, vector<16x32xf32>
    tpu.vector_store %arg12[%c0_59, %c0_60], %236 {strides = array<i32>} : memref<16x32xf32, #tpu.memory_space<vmem>>, vector<16x32xf32>,
    %c0_61 = arith.constant 0 : index
    %c0_62 = arith.constant 0 : index
    %238 = vector.load %arg13[%c0_61, %c0_62] : memref<2x64xf32, #tpu.memory_space<vmem>>, vector<2x64xf32>
    tpu.vector_store %arg13[%c0_61, %c0_62], %197 {strides = array<i32>} : memref<2x64xf32, #tpu.memory_space<vmem>>, vector<2x64xf32>,
    %c0_63 = arith.constant 0 : index
    %c0_64 = arith.constant 0 : index
    %239 = vector.load %arg14[%c0_63, %c0_64] : memref<2x64xf32, #tpu.memory_space<vmem>>, vector<2x64xf32>
    tpu.vector_store %arg14[%c0_63, %c0_64], %198 {strides = array<i32>} : memref<2x64xf32, #tpu.memory_space<vmem>>, vector<2x64xf32>,
    return
  }
}

</mosaic_0001>

<bundles_post_ra>
// kernel: tpu_custom_call.1
= control target key start
LH: loop header
LB: loop body
LE: loop exit
PB: predicated region body
PF: predicated region fallthrough
CT: control target
= control target key end

     0   :  { %20 = vsyncpa [#allocation3], 0  ;;  %s2336_s0 = inlined_call_operand.vmem [shape: f32[16,8], index: 0, kind: input, shape index: {}]   ;;  %s2337_s1 = inlined_call_operand.vmem [shape: f32[2,64], index: 1, kind: input, shape index: {}]   ;;  %s2338_s2 = inlined_call_operand.vmem [shape: f32[2,64], index: 2, kind: input, shape index: {}]   ;;  %s2339_s3 = inlined_call_operand.hbm [shape: f32[8,256], index: 3, kind: input, shape index: {}]   ;;  %s2340_s4 = inlined_call_operand.vmem [shape: f32[1,256], index: 4, kind: input, shape index: {}]   ;;  %s2341_s5 = inlined_call_operand.hbm [shape: f32[64,256], index: 5, kind: input, shape index: {}]   ;;  %s2342_s6 = inlined_call_operand.hbm [shape: f32[1,32], index: 6, kind: input, shape index: {}]   ;;  %s2343_s7 = inlined_call_operand.hbm [shape: f32[1,32], index: 7, kind: input, shape index: {}]   ;;  %s2344_s8 = inlined_call_operand.vmem [shape: f32[32,32], index: 8, kind: input, shape index: {}]   ;;  %s2345_s9 = inlined_call_operand.vmem [shape: f32[1,32], index: 9, kind: input, shape index: {}]   ;;  %s2346_s10 = inlined_call_operand.hbm [shape: f32[32,32], index: 10, kind: input, shape index: {}]   ;;  %s2347_s11 = inlined_call_operand.vmem [shape: f32[1,32], index: 11, kind: input, shape index: {}]   ;;  %s2348_s12 = inlined_call_operand.hbm [shape: f32[16,32], index: 12, kind: output, shape index: {0}]   ;;  %s2349_s13 = inlined_call_operand.hbm [shape: f32[2,64], index: 13, kind: output, shape index: {1}]   ;;  %s2350_s14 = inlined_call_operand.hbm [shape: f32[2,64], index: 14, kind: output, shape index: {2}]  }
   0x1   :  { %21 = vsyncpa [#allocation6], 0 }
   0x2   :  { %22 = vsyncpa [#allocation9], 0 }
   0x3   :  { %23 = vsyncpa [#allocation4], 0 }
   0x4   :  { %24 = vsyncpa [#allocation13], 0  ;;  %s1826_s29 = smov [#allocation5]  }
   0x5   :  { %s48_s30 = sshll.u32 %s1826_s29, 4  ;;  %s49_s30 = int_to_ptr.vmem [resolvable:$true] %s48_s30 }
   0x6   :  { %s1664_s15 = scalar_lea.vmem %s49_s30, 2048  ;;  %p1669_p1 = scmp.lt.s32.totalorder %s49_s30, %s49_s30 }
   0x7   :  { %p1665_p0 = scmp.ne.s32.totalorder %s49_s30, %s1664_s15  ;;  %p1670_p2 = scmp.lt.s32.totalorder %s1664_s15, %s1664_s15 }
   0x9   :  { %p1671_p3 = por %p1670_p2, %p1669_p1 }
   0xb   :  { %p1672_p4 = pnand %p1671_p3, %p1665_p0 }
   0xd   :  { %1675 = shalt.err (!%p1672_p4)
}
   0xe   :  { %s1827_s16 = smov 256   ;;  %s1828_s17 = smov 16  }
   0xf   :  { %54 = dma.hbm_to_vmem [thread:$0]  %s2341_s5, 2048, %s49_s30, [#allocation6], %s1827_s16, %s1827_s16, %s1828_s17  }
  0x10   :  { %s1829_s20 = smov [#allocation8]   ;;  %s1830_s22 = smov [#allocation2]  }
  0x11   :  { %s71_s21 = sshll.u32 %s1829_s20, 4  ;;  %s37_s23 = sshll.u32 %s1830_s22, 4  ;;  %s72_s21 = int_to_ptr.vmem [resolvable:$true] %s71_s21  ;;  %s38_s23 = int_to_ptr.vmem [resolvable:$true] %s37_s23 }
  0x12   :  { %s1684_s24 = scalar_lea.vmem %s72_s21, 16  ;;  %s1688_s25 = scalar_lea.vmem %s72_s21, 32 }
  0x13   :  { %p1685_p5 = scmp.ne.s32.totalorder %s72_s21, %s1684_s24  ;;  %p1689_p6 = scmp.lt.s32.totalorder %s72_s21, %s72_s21 }
  0x14   :  { %p1690_p7 = scmp.lt.s32.totalorder %s1688_s25, %s1684_s24 }
  0x16   :  { %p1691_p8 = por %p1690_p7, %p1689_p6 }
  0x18   :  { %p1692_p9 = pnand %p1691_p8, %p1685_p5 }
  0x1a   :  { %1695 = shalt.err (!%p1692_p9)
}
  0x1b   :  { %74 = dma.hbm_to_vmem [thread:$0]  %s2343_s7, 16, %s72_s21, [#allocation9]  }
  0x1c   :  { %s1704_s28 = scalar_lea.vmem %s38_s23, 256  ;;  %p1709_p11 = scmp.lt.s32.totalorder %s38_s23, %s38_s23 }
  0x1d   :  { %p1705_p10 = scmp.ne.s32.totalorder %s38_s23, %s1704_s28  ;;  %p1710_p12 = scmp.lt.s32.totalorder %s1704_s28, %s1704_s28 }
  0x1f   :  { %p1711_p13 = por %p1710_p12, %p1709_p11 }
  0x21   :  { %p1712_p0 = pnand %p1711_p13, %p1705_p10 }
  0x23   :  { %1715 = shalt.err (!%p1712_p0)
}
  0x24   :  { %40 = dma.hbm_to_vmem [thread:$0]  %s2339_s3, 256, %s38_s23, [#allocation3]  }
  0x25   :  { %s1831_s30 = smov [#allocation7]   ;;  %s1832_s16 = smov [#allocation10]  }
  0x26   :  { %s61_s15 = sshll.u32 %s1831_s30, 4  ;;  %s84_s17 = sshll.u32 %s1832_s16, 4  ;;  %s62_s15 = int_to_ptr.vmem [resolvable:$true] %s61_s15  ;;  %s85_s17 = int_to_ptr.vmem [resolvable:$true] %s84_s17 }
  0x27   :  { %s1724_s18 = scalar_lea.vmem %s62_s15, 16  ;;  %s1728_s7 = scalar_lea.vmem %s62_s15, 32 }
  0x28   :  { %p1725_p1 = scmp.ne.s32.totalorder %s62_s15, %s1724_s18  ;;  %p1729_p2 = scmp.lt.s32.totalorder %s62_s15, %s62_s15 }
  0x29   :  { %p1730_p3 = scmp.lt.s32.totalorder %s1728_s7, %s1724_s18 }
  0x2b   :  { %p1731_p4 = por %p1730_p3, %p1729_p2 }
  0x2d   :  { %p1732_p5 = pnand %p1731_p4, %p1725_p1 }
  0x2f   :  { %1735 = shalt.err (!%p1732_p5)
}
  0x30   :  { %64 = dma.hbm_to_vmem [thread:$0]  %s2342_s6, 16, %s62_s15, [#allocation6]  }
  0x31   :  { %s1744_s21 = scalar_lea.vmem %s85_s17, 512  ;;  %p1749_p7 = scmp.lt.s32.totalorder %s85_s17, %s85_s17 }
  0x32   :  { %p1745_p6 = scmp.ne.s32.totalorder %s85_s17, %s1744_s21  ;;  %p1750_p8 = scmp.lt.s32.totalorder %s1744_s21, %s1744_s21 }
  0x34   :  { %p1751_p9 = por %p1750_p8, %p1749_p7 }
  0x36   :  { %p1752_p10 = pnand %p1751_p9, %p1745_p6 }
  0x38   :  { %1755 = shalt.err (!%p1752_p10)
}
  0x39   :  { %s1833_s3 = smov 128   ;;  %s1834_s22 = smov 8  }
  0x3a   :  { %90 = dma.hbm_to_vmem [thread:$0]  %s2346_s10, 512, %s85_s17, [#allocation9], %s1833_s3, %s1833_s3, %s1834_s22  }
  0x3b   :  { %1816 = dma.done.wait [#allocation3], 256  }
  0x3c   :  { %1817 = vsyncadd [#allocation3], 4294967040 }
  0x3d   :  { %1818 = dma.done.wait [#allocation6], 2064  }
  0x3e   :  { %1819 = vsyncadd [#allocation6], 4294965232 }
  0x3f   :  { %1820 = dma.done.wait [#allocation9], 528  }
  0x40   :  { %1821 = vsyncadd [#allocation9], 4294966768  ;;  %v1835_v0 = vmov 0.0   ;;  %v1937_v1 = vld [vmem:[#allocation5 + $0x78] sm:$0xff]  ;;  %v1939_v2 = vld [vmem:[#allocation5 + $0x70] sm:$0xff]  ;;  %vm124_vm0 = vcmask 64512   ;;  %v114_v22 = vlaneseq }
  0x41   :  { %195 = vmatprep.mubr.f32.mxu0 %v1835_v0  ;;  %303 = vmatprep.mubr.f32.mxu1 %v1835_v0  ;;  %v1941_v3 = vld [vmem:[#allocation5 + $0x68] sm:$0xff]  ;;  %v1944_v4 = vld [vmem:[#allocation5 + $0x60] sm:$0xff]  ;;  %v1947_v5 = vld [vmem:[#allocation5 + $0x58] sm:$0xff]  ;;  %s1836_s27 = smov 64   ;;  %vm235_vm1 = vcmask 523264   ;;  %vm1213_vm4 = vcmask 1041408  }
  0x42   :  { %255 = vmatprep.subr.mxu1 %v1937_v1  ;;  %v1950_v6 = vld [vmem:[#allocation5 + $0x50] sm:$0xff]  ;;  %v111_v7 = vld [vmem:[#allocation2 + $0x8] sm:$0xff]  ;;  %v1953_v8 = vld [vmem:[#allocation5 + $0x48] sm:$0xff]  ;;  %v115_v23 = vshrl.u32 %v114_v22, 7  ;;  %v2054_v37 = vand.u32 127, %v114_v22  ;;  %vm1215_vm5 = vcmask 1043456  }
  0x43   :  { %256 = vmatpush1.msra.mxu1 %v1939_v2  ;;  %161 = vmatprep.subr.mxu0 %v111_v7  ;;  %v110_v9 = vld [vmem:[#allocation2] sm:$0xff]  ;;  %v1959_v11 = vld [vmem:[#allocation5 + $0x40] sm:$0xff]  ;;  %v1962_v12 = vld [vmem:[#allocation5 + $0x38] sm:$0xff]  ;;  %vm1217_vm6 = vcmask 1045504   ;;  %vm1480_vm10 = vcmask 517120   ;;  %vm1230_vm11 = vcmask 261120  }
  0x44   :  { %257 = vmatprep.subr.mxu1 %v1941_v3  ;;  %v108_v10 = vld [vmem:[%s2336_s0] sm:$0xff]  ;;  %162 = vmatpush1.msra.mxu0 %v110_v9  ;;  %v1976_v15 = vld [vmem:[#allocation5 + $0x28] sm:$0xff]  ;;  %v1980_v16 = vld [vmem:[#allocation5 + $0x20] sm:$0xff]  ;;  %v116_v24 = vsub.s32 0, %v115_v23  ;;  %v120_v27 = vsub.s32 1, %v115_v23  ;;  %v2057_v39 = vadd.s32 128, %v2054_v37 }
  0x45   :  { %258 = vmatpush1.msra.mxu1 %v1944_v4  ;;  %1529 = vmatmul.mubr.msk.f32.vlgmr.msra.gmra.mxu0 %vm124_vm0, %v108_v10  ;;  %v1968_v13 = vld [vmem:[%s2338_s2] sm:$0x3]  ;;  %v1984_v17 = vld [vmem:[#allocation5 + $0x18] sm:$0xff]  ;;  %v1992_v19 = vld [vmem:[#allocation5 + $0x8] sm:$0xff]  ;;  %vm334_vm3 = vcmp.lt.s32.totalorder %v2054_v37, 32  ;;  %vm1175_vm7 = vcmp.ge.s32.totalorder %v2054_v37, 32 }
  0x46   :  { %259 = vmatprep.subr.mxu1 %v1947_v5  ;;  %v1971_v14 = vld [vmem:[#allocation5 + $0x30] sm:$0xff]  ;;  %321 = vrot.lane.b32.xlu0 %v1968_v13, %s1836_s27  ;;  %v1996_v20 = vld [vmem:[#allocation5] sm:$0xff]  ;;  %vm230_vm2 = vcmp.lt.s32.totalorder %v2057_v39, 192  ;;  %v109_v47 = vld [vmem:[%s2336_s0 + $0x8] sm:$0xff]  ;;  %s1837_s0 = smov 32   ;;  %vm1176_vm8 = vcmp.lt.s32.totalorder %v2054_v37, 64 }
  0x47   :  { %260 = vmatpush1.msra.mxu1 %v1950_v6  ;;  %365 = vmatprep.subr.mxu0 %v1937_v1  ;;  %v1988_v18 = vld [vmem:[#allocation5 + $0x10] sm:$0xff]  ;;  %vm2274_vm9 = vmand %vm1175_vm7, %vm1176_vm8  ;;  %s1838_s30 = smov 96   ;;  %s1839_s24 = smov [#allocation12]  }
  0x48   :  { %261 = vmatprep.subr.mxu1 %v1953_v8  ;;  %366 = vmatpush1.msra.mxu0 %v1939_v2  ;;  %v2003_v21 = vld [vmem:[%s2337_s1] sm:$0x3]  ;;  %s1501_s6 = sshll.u32 %s1839_s24, 4  ;;  %s1502_s6 = int_to_ptr.vmem [resolvable:$true] %s1501_s6 }
  0x49   :  { %262 = vmatpush1.msra.mxu1 %v1959_v11  ;;  %367 = vmatprep.subr.mxu0 %v1941_v3  ;;  %v112_v25 = vld [vmem:[%s2340_s4] sm:$0x3]  ;;  %s1756_s10 = scalar_lea.vmem %s1502_s6, 32  ;;  %p1761_p12 = scmp.lt.s32.totalorder %s1502_s6, %s1502_s6 }
  0x4a   :  { %263 = vmatprep.subr.mxu1 %v1962_v12  ;;  %368 = vmatpush1.msra.mxu0 %v1944_v4  ;;  %v2042_v26 = vrot.slane %v112_v25, %v116_v24  ;;  %v2047_v30 = vrot.slane %v112_v25, %v120_v27  ;;  %p1757_p11 = scmp.ne.s32.totalorder %s1502_s6, %s1756_s10  ;;  %p1762_p13 = scmp.lt.s32.totalorder %s1756_s10, %s1756_s10 }
  0x4b   :  { %264 = vmatpush1.msra.mxu1 %v1971_v14  ;;  %369 = vmatprep.subr.mxu0 %v1947_v5 }
  0x4c   :  { %265 = vmatprep.subr.mxu1 %v1976_v15  ;;  %370 = vmatpush1.msra.mxu0 %v1950_v6  ;;  %p1763_p0 = por %p1762_p13, %p1761_p12 }
  0x4d   :  { %266 = vmatpush1.msra.mxu1 %v1980_v16  ;;  %371 = vmatprep.subr.mxu0 %v1953_v8 }
  0x4e   :  { %267 = vmatprep.subr.mxu1 %v1984_v17  ;;  %372 = vmatpush1.msra.mxu0 %v1959_v11  ;;  %p1764_p1 = pnand %p1763_p0, %p1757_p11 }
  0x4f   :  { %268 = vmatpush1.msra.mxu1 %v1988_v18  ;;  %373 = vmatprep.subr.mxu0 %v1962_v12 }
  0x50   :  { %269 = vmatprep.subr.mxu1 %v1992_v19  ;;  %201 = vmatprep.mubr.f32.mxu0 %v1835_v0 }
  0x51   :  { %270 = vmatpush1.msra.mxu1 %v1996_v20  ;;  %374 = vmatpush1.msra.mxu0 %v1971_v14 }
  0x52   :  { %1531 = vmatmul.mubr.msk.f32.vlgmr.msra.gmra.mxu1 %vm235_vm1, %v2003_v21  ;;  %472 = vmatprep.subr.mxu1 %v1937_v1 }
  0x53   :  { %375 = vmatprep.subr.mxu0 %v1976_v15  ;;  %473 = vmatpush1.msra.mxu1 %v1939_v2 }
  0x54   :  { %376 = vmatpush1.msra.mxu0 %v1980_v16  ;;  %474 = vmatprep.subr.mxu1 %v1941_v3 }
  0x55   :  { %377 = vmatprep.subr.mxu0 %v1984_v17  ;;  %475 = vmatpush1.msra.mxu1 %v1944_v4 }
  0x56   :  { %378 = vmatpush1.msra.mxu0 %v1988_v18  ;;  %476 = vmatprep.subr.mxu1 %v1947_v5 }
  0x57   :  { %379 = vmatprep.subr.mxu0 %v1992_v19  ;;  %477 = vmatpush1.msra.mxu1 %v1950_v6 }
  0x58   :  { %380 = vmatpush1.msra.mxu0 %v1996_v20  ;;  %478 = vmatprep.subr.mxu1 %v1953_v8 }
  0x59   :  { %479 = vmatpush1.msra.mxu1 %v1959_v11  ;;  %520 = vmatprep.mubr.f32.mxu1 %v1835_v0 }
  0x5a   :  { %480 = vmatprep.subr.mxu1 %v1962_v12  ;;  %577 = vmatprep.subr.mxu0 %v1937_v1 }
  0x5b   :  { %481 = vmatpush1.msra.mxu1 %v1971_v14  ;;  %1530 = vmatmul.mubr.msk.f32.gmra.mxu0 %vm124_vm0, %v109_v47 }
  0x5c   :  { %482 = vmatprep.subr.mxu1 %v1976_v15  ;;  %413 = vmatprep.mubr.f32.mxu0 %v1835_v0 }
  0x5d   :  { %483 = vmatpush1.msra.mxu1 %v1980_v16 }
  0x5e   :  { %484 = vmatprep.subr.mxu1 %v1984_v17 }
  0x5f   :  { %485 = vmatpush1.msra.mxu1 %v1988_v18 }
  0x60   :  { %486 = vmatprep.subr.mxu1 %v1992_v19 }
  0x61   :  { %487 = vmatpush1.msra.mxu1 %v1996_v20 }
  0x62   :  { %682 = vmatprep.subr.mxu1 %v1937_v1 }
  0xb8   :  { %v322_v48 = vpop.permute.xlu0 %321 }
 0x105   :  { %v197_v28 = vpop.f32.mrf.mxu0 }
 0x106   :  { %v2045_v29 = vadd.f32 %v197_v28, %v2042_v26 }
 0x107   :  { %v199_v31 = vpop.f32.mrf.mxu0 }
 0x108   :  { %v2050_v33 = vadd.f32 %v199_v31, %v2047_v30 }
 0x112   :  { %v305_v32 = vpop.f32.mrf.mxu1 }
 0x113   :  { %v310_v34 = vadd.f32 %v305_v32, %v2045_v29 }
 0x114   :  { %v307_v35 = vpop.f32.mrf.mxu1 }
 0x115   :  { %1598 = vtanh.f32 %v310_v34  ;;  %v311_v36 = vadd.f32 %v307_v35, %v2050_v33 }
 0x117   :  { %1600 = vtanh.f32 %v311_v36 }
 0x11b   :  { %v2092_v59 = vpop.f32.mrf.mxu0 }
 0x11d   :  { %v2094_v60 = vpop.f32.mrf.mxu0 }
 0x122   :  { %v1599_v38 = vpop.eup %1598 }
 0x123   :  { %v314_v41 = vmul.f32 0.5, %v1599_v38 }
 0x124   :  { %v1601_v40 = vpop.eup %1600 }
 0x125   :  { %v315_v42 = vmul.f32 0.5, %v1601_v40  ;;  %v316_v44 = vadd.f32 0.5, %v314_v41 }
 0x127   :  { %v317_v43 = vadd.f32 0.5, %v315_v42  ;;  %v324_v49 = vmul.f32 %v322_v48, %v316_v44 }
 0x129   :  { %v319_v45 = vsel %vm230_vm2, %v1601_v40, %v317_v43 }
 0x12a   :  { %v325_v46 = vmul.f32 %v319_v45, %v316_v44 }
 0x12c   :  { %327 = vrot.lane.b32.xlu0 %v325_v46, %s1836_s27 }
 0x19e   :  { %v328_v50 = vpop.permute.xlu0 %327 }
 0x19f   :  { %v330_v51 = vadd.f32 %v328_v50, %v324_v49 }
 0x1a1   :  { %1602 = vtanh.f32 %v330_v51 }
 0x1ae   :  { %v1603_v52 = vpop.eup %1602 }
 0x1af   :  { %v332_v53 = vmul.f32 %v1603_v52, %v319_v45 }
 0x1b1   :  { %337 = vrot.lane.b32.xlu1 %v332_v53, %s1836_s27 }
 0x1b5   :  { %342 = vrot.lane.b32.xlu1 %v330_v51, %s1836_s27 }
 0x223   :  { %v338_v54 = vpop.permute.xlu1 %337 }
 0x224   :  { %v340_v55 = vsel %vm334_vm3, %v338_v54, %v2003_v21 }
 0x225   :  { %1532 = vmatmul.mubr.msk.f32.vlgmr.msra.gmra.mxu0 %vm235_vm1, %v340_v55 }
 0x226   :  { %578 = vmatpush1.msra.mxu0 %v1939_v2  ;;  %625 = vmatprep.mubr.f32.mxu0 %v1835_v0 }
 0x227   :  { %v343_v56 = vpop.permute.xlu1 %342  ;;  %579 = vmatprep.subr.mxu0 %v1941_v3 }
 0x228   :  { %v345_v57 = vsel %vm334_vm3, %v343_v56, %v1968_v13  ;;  %580 = vmatpush1.msra.mxu0 %v1944_v4 }
 0x229   :  { %v437_v58 = vrot.slane %v345_v57, 6  ;;  %581 = vmatprep.subr.mxu0 %v1947_v5 }
 0x22a   :  { %582 = vmatpush1.msra.mxu0 %v1950_v6 }
 0x22b   :  { %438 = vrot.lane.b32.xlu0 %v437_v58, %s1836_s27  ;;  %583 = vmatprep.subr.mxu0 %v1953_v8 }
 0x22c   :  { %584 = vmatpush1.msra.mxu0 %v1959_v11 }
 0x22d   :  { %585 = vmatprep.subr.mxu0 %v1962_v12 }
 0x22e   :  { %586 = vmatpush1.msra.mxu0 %v1971_v14 }
 0x22f   :  { %587 = vmatprep.subr.mxu0 %v1976_v15 }
 0x230   :  { %588 = vmatpush1.msra.mxu0 %v1980_v16 }
 0x231   :  { %589 = vmatprep.subr.mxu0 %v1984_v17 }
 0x232   :  { %590 = vmatpush1.msra.mxu0 %v1988_v18 }
 0x233   :  { %591 = vmatprep.subr.mxu0 %v1992_v19 }
 0x234   :  { %592 = vmatpush1.msra.mxu0 %v1996_v20 }
 0x235   :  { %780 = vmatprep.subr.mxu0 %v1937_v1 }
 0x29d   :  { %v439_v31 = vpop.permute.xlu0 %438 }
 0x2e5   :  { %v415_v61 = vpop.f32.mrf.mxu0 }
 0x2e6   :  { %v422_v62 = vrot.slane %v415_v61, 6 }
 0x2e7   :  { %v417_v63 = vpop.f32.mrf.mxu0 }
 0x2e8   :  { %v426_v7 = vadd.f32 %v422_v62, %v2045_v29  ;;  %v423_v9 = vrot.slane %v417_v63, 6 }
 0x2ea   :  { %1604 = vtanh.f32 %v426_v7  ;;  %v427_v10 = vadd.f32 %v423_v9, %v2050_v33 }
 0x2ec   :  { %1606 = vtanh.f32 %v427_v10 }
 0x2f7   :  { %v1605_v13 = vpop.eup %1604 }
 0x2f8   :  { %v430_v22 = vmul.f32 0.5, %v1605_v13 }
 0x2f9   :  { %v1607_v21 = vpop.eup %1606 }
 0x2fa   :  { %v431_v23 = vmul.f32 0.5, %v1607_v21  ;;  %v432_v25 = vadd.f32 0.5, %v430_v22 }
 0x2fc   :  { %v433_v24 = vadd.f32 0.5, %v431_v23  ;;  %v441_v32 = vmul.f32 %v439_v31, %v432_v25 }
 0x2fe   :  { %v435_v27 = vsel %vm230_vm2, %v1607_v21, %v433_v24 }
 0x2ff   :  { %v442_v28 = vmul.f32 %v435_v27, %v432_v25 }
 0x301   :  { %444 = vrot.lane.b32.xlu1 %v442_v28, %s1836_s27 }
 0x373   :  { %v445_v34 = vpop.permute.xlu1 %444 }
 0x374   :  { %v447_v35 = vadd.f32 %v445_v34, %v441_v32 }
 0x376   :  { %1608 = vtanh.f32 %v447_v35  ;;  %v544_v51 = vrot.slane %v447_v35, 6 }
 0x383   :  { %v1609_v36 = vpop.eup %1608 }
 0x384   :  { %v2101_v38 = vmul.f32 %v1609_v36, %v435_v27 }
 0x386   :  { %v451_v40 = vrot.slane %v2101_v38, 2  ;;  %v2179_v38 = vadd.f32 %v2092_v59, %v2042_v26 }
 0x388   :  { %452 = vrot.lane.b32.xlu0 %v451_v40, %s1836_s27 }
 0x3fa   :  { %v453_v41 = vpop.permute.xlu0 %452 }
 0x3fb   :  { %1533 = vmatmul.mubr.msk.f32.vlgmr.msra.gmra.mxu1 %vm235_vm1, %v453_v41 }
 0x3fc   :  { %683 = vmatpush1.msra.mxu1 %v1939_v2  ;;  %730 = vmatprep.mubr.f32.mxu1 %v1835_v0 }
 0x3fd   :  { %684 = vmatprep.subr.mxu1 %v1941_v3 }
 0x3fe   :  { %685 = vmatpush1.msra.mxu1 %v1944_v4 }
 0x3ff   :  { %686 = vmatprep.subr.mxu1 %v1947_v5 }
 0x400   :  { %687 = vmatpush1.msra.mxu1 %v1950_v6 }
 0x401   :  { %688 = vmatprep.subr.mxu1 %v1953_v8 }
 0x402   :  { %689 = vmatpush1.msra.mxu1 %v1959_v11 }
 0x403   :  { %690 = vmatprep.subr.mxu1 %v1962_v12 }
 0x404   :  { %691 = vmatpush1.msra.mxu1 %v1971_v14 }
 0x405   :  { %692 = vmatprep.subr.mxu1 %v1976_v15 }
 0x406   :  { %693 = vmatpush1.msra.mxu1 %v1980_v16 }
 0x407   :  { %694 = vmatprep.subr.mxu1 %v1984_v17 }
 0x408   :  { %695 = vmatpush1.msra.mxu1 %v1988_v18 }
 0x409   :  { %696 = vmatprep.subr.mxu1 %v1992_v19 }
 0x40a   :  { %697 = vmatpush1.msra.mxu1 %v1996_v20 }
 0x40b   :  { %885 = vmatprep.subr.mxu1 %v1937_v1 }
 0x4bb   :  { %v522_v42 = vpop.f32.mrf.mxu1 }
 0x4bc   :  { %v529_v43 = vrot.slane %v522_v42, 4 }
 0x4bd   :  { %v524_v44 = vpop.f32.mrf.mxu1 }
 0x4be   :  { %v533_v45 = vadd.f32 %v529_v43, %v2045_v29  ;;  %v530_v46 = vrot.slane %v524_v44, 4 }
 0x4c0   :  { %1610 = vtanh.f32 %v533_v45  ;;  %v534_v47 = vadd.f32 %v530_v46, %v2050_v33 }
 0x4c2   :  { %1612 = vtanh.f32 %v534_v47 }
 0x4cd   :  { %v1611_v48 = vpop.eup %1610 }
 0x4ce   :  { %v537_v49 = vmul.f32 0.5, %v1611_v48 }
 0x4cf   :  { %v1613_v50 = vpop.eup %1612 }
 0x4d0   :  { %v538_v52 = vmul.f32 0.5, %v1613_v50  ;;  %v539_v53 = vadd.f32 0.5, %v537_v49 }
 0x4d2   :  { %v540_v54 = vadd.f32 0.5, %v538_v52  ;;  %v546_v55 = vmul.f32 %v544_v51, %v539_v53  ;;  %v2183_v51 = vadd.f32 %v2094_v60, %v2047_v30 }
 0x4d4   :  { %v542_v56 = vsel %vm230_vm2, %v1613_v50, %v540_v54 }
 0x4d5   :  { %v547_v57 = vmul.f32 %v542_v56, %v539_v53 }
 0x4d7   :  { %549 = vrot.lane.b32.xlu1 %v547_v57, %s1836_s27 }
 0x549   :  { %v550_v58 = vpop.permute.xlu1 %549 }
 0x54a   :  { %v552_v61 = vadd.f32 %v550_v58, %v546_v55 }
 0x54c   :  { %1614 = vtanh.f32 %v552_v61  ;;  %v649_v31 = vrot.slane %v552_v61, 6 }
 0x559   :  { %v1615_v62 = vpop.eup %1614 }
 0x55a   :  { %v554_v63 = vmul.f32 %v1615_v62, %v542_v56 }
 0x55c   :  { %v556_v7 = vrot.slane %v554_v63, 4 }
 0x55e   :  { %557 = vrot.lane.b32.xlu0 %v556_v7, %s1836_s27 }
 0x5d0   :  { %v558_v9 = vpop.permute.xlu0 %557 }
 0x5d1   :  { %1534 = vmatmul.mubr.msk.f32.vlgmr.msra.gmra.mxu0 %vm235_vm1, %v558_v9 }
 0x5d2   :  { %781 = vmatpush1.msra.mxu0 %v1939_v2  ;;  %828 = vmatprep.mubr.f32.mxu0 %v1835_v0 }
 0x5d3   :  { %782 = vmatprep.subr.mxu0 %v1941_v3 }
 0x5d4   :  { %783 = vmatpush1.msra.mxu0 %v1944_v4 }
 0x5d5   :  { %784 = vmatprep.subr.mxu0 %v1947_v5 }
 0x5d6   :  { %785 = vmatpush1.msra.mxu0 %v1950_v6 }
 0x5d7   :  { %786 = vmatprep.subr.mxu0 %v1953_v8 }
 0x5d8   :  { %787 = vmatpush1.msra.mxu0 %v1959_v11 }
 0x5d9   :  { %788 = vmatprep.subr.mxu0 %v1962_v12 }
 0x5da   :  { %789 = vmatpush1.msra.mxu0 %v1971_v14 }
 0x5db   :  { %790 = vmatprep.subr.mxu0 %v1976_v15 }
 0x5dc   :  { %791 = vmatpush1.msra.mxu0 %v1980_v16 }
 0x5dd   :  { %792 = vmatprep.subr.mxu0 %v1984_v17 }
 0x5de   :  { %793 = vmatpush1.msra.mxu0 %v1988_v18 }
 0x5df   :  { %794 = vmatprep.subr.mxu0 %v1992_v19 }
 0x5e0   :  { %795 = vmatpush1.msra.mxu0 %v1996_v20 }
 0x5e1   :  { %990 = vmatprep.subr.mxu0 %v1937_v1 }
 0x691   :  { %v627_v10 = vpop.f32.mrf.mxu0 }
 0x692   :  { %v634_v13 = vrot.slane %v627_v10, 2 }
 0x693   :  { %v629_v21 = vpop.f32.mrf.mxu0 }
 0x694   :  { %v638_v22 = vadd.f32 %v634_v13, %v2045_v29  ;;  %v635_v23 = vrot.slane %v629_v21, 2 }
 0x696   :  { %1616 = vtanh.f32 %v638_v22  ;;  %v639_v24 = vadd.f32 %v635_v23, %v2050_v33  ;;  %v1197_v33 = vrot.slane %v554_v63, 2 }
 0x698   :  { %1618 = vtanh.f32 %v639_v24  ;;  %v1214_v48 = vsel %vm1213_vm4, %v451_v40, %v1197_v33 }
 0x6a3   :  { %v1617_v25 = vpop.eup %1616 }
 0x6a4   :  { %v642_v27 = vmul.f32 0.5, %v1617_v25 }
 0x6a5   :  { %v1619_v28 = vpop.eup %1618 }
 0x6a6   :  { %v643_v32 = vmul.f32 0.5, %v1619_v28  ;;  %v644_v34 = vadd.f32 0.5, %v642_v27 }
 0x6a8   :  { %v645_v35 = vadd.f32 0.5, %v643_v32  ;;  %v651_v36 = vmul.f32 %v649_v31, %v644_v34 }
 0x6aa   :  { %v647_v41 = vsel %vm230_vm2, %v1619_v28, %v645_v35 }
 0x6ab   :  { %v652_v42 = vmul.f32 %v647_v41, %v644_v34 }
 0x6ad   :  { %654 = vrot.lane.b32.xlu1 %v652_v42, %s1836_s27 }
 0x71f   :  { %v655_v29 = vpop.permute.xlu1 %654 }
 0x720   :  { %v657_v43 = vadd.f32 %v655_v29, %v651_v36 }
 0x722   :  { %1620 = vtanh.f32 %v657_v43 }
 0x72f   :  { %v1621_v44 = vpop.eup %1620 }
 0x730   :  { %v659_v45 = vmul.f32 %v1621_v44, %v647_v41 }
 0x732   :  { %v661_v46 = vrot.slane %v659_v45, 6  ;;  %v1199_v47 = vrot.slane %v659_v45, 2 }
 0x734   :  { %662 = vrot.lane.b32.xlu0 %v661_v46, %s1836_s27  ;;  %v1216_v49 = vsel %vm1215_vm5, %v1214_v48, %v1199_v47 }
 0x7a6   :  { %v663_v50 = vpop.permute.xlu0 %662 }
 0x7a7   :  { %1535 = vmatmul.mubr.msk.f32.vlgmr.msra.gmra.mxu1 %vm235_vm1, %v663_v50 }
 0x7a8   :  { %886 = vmatpush1.msra.mxu1 %v1939_v2  ;;  %933 = vmatprep.mubr.f32.mxu1 %v1835_v0 }
 0x7a9   :  { %887 = vmatprep.subr.mxu1 %v1941_v3 }
 0x7aa   :  { %888 = vmatpush1.msra.mxu1 %v1944_v4 }
 0x7ab   :  { %889 = vmatprep.subr.mxu1 %v1947_v5 }
 0x7ac   :  { %890 = vmatpush1.msra.mxu1 %v1950_v6 }
 0x7ad   :  { %891 = vmatprep.subr.mxu1 %v1953_v8 }
 0x7ae   :  { %892 = vmatpush1.msra.mxu1 %v1959_v11 }
 0x7af   :  { %893 = vmatprep.subr.mxu1 %v1962_v12 }
 0x7b0   :  { %894 = vmatpush1.msra.mxu1 %v1971_v14 }
 0x7b1   :  { %895 = vmatprep.subr.mxu1 %v1976_v15 }
 0x7b2   :  { %896 = vmatpush1.msra.mxu1 %v1980_v16 }
 0x7b3   :  { %897 = vmatprep.subr.mxu1 %v1984_v17 }
 0x7b4   :  { %898 = vmatpush1.msra.mxu1 %v1988_v18 }
 0x7b5   :  { %899 = vmatprep.subr.mxu1 %v1992_v19 }
 0x7b6   :  { %900 = vmatpush1.msra.mxu1 %v1996_v20 }
 0x7b7   :  { %1095 = vmatprep.subr.mxu1 %v1937_v1  ;;  %v748_v1 = vrot.slane %v657_v43, 6 }
 0x867   :  { %v732_v40 = vpop.f32.mrf.mxu1 }
 0x868   :  { %v737_v52 = vadd.f32 %v732_v40, %v2179_v38 }
 0x869   :  { %v734_v53 = vpop.f32.mrf.mxu1 }
 0x86a   :  { %1622 = vtanh.f32 %v737_v52  ;;  %v738_v54 = vadd.f32 %v734_v53, %v2183_v51 }
 0x86c   :  { %1624 = vtanh.f32 %v738_v54 }
 0x877   :  { %v1623_v55 = vpop.eup %1622 }
 0x878   :  { %v741_v56 = vmul.f32 0.5, %v1623_v55 }
 0x879   :  { %v1625_v57 = vpop.eup %1624 }
 0x87a   :  { %v743_v58 = vadd.f32 0.5, %v741_v56  ;;  %v742_v61 = vmul.f32 0.5, %v1625_v57 }
 0x87c   :  { %v744_v26 = vadd.f32 0.5, %v742_v61  ;;  %v750_v59 = vmul.f32 %v748_v1, %v743_v58 }
 0x87e   :  { %v746_v62 = vsel %vm230_vm2, %v1625_v57, %v744_v26 }
 0x87f   :  { %v751_v30 = vmul.f32 %v746_v62, %v743_v58 }
 0x881   :  { %753 = vrot.lane.b32.xlu1 %v751_v30, %s1836_s27 }
 0x8f3   :  { %v754_v60 = vpop.permute.xlu1 %753 }
 0x8f4   :  { %v756_v63 = vadd.f32 %v754_v60, %v750_v59 }
 0x8f6   :  { %1626 = vtanh.f32 %v756_v63  ;;  %v852_v35 = vrot.slane %v756_v63, 6 }
 0x903   :  { %v1627_v7 = vpop.eup %1626 }
 0x904   :  { %v758_v9 = vmul.f32 %v1627_v7, %v746_v62 }
 0x906   :  { %760 = vrot.lane.b32.xlu0 %v758_v9, %s1836_s27  ;;  %v1201_v10 = vrot.slane %v758_v9, 2 }
 0x908   :  { %v2192_v13 = vsel %vm1217_vm6, %v1216_v49, %v1201_v10 }
 0x978   :  { %v761_v21 = vpop.permute.xlu0 %760 }
 0x979   :  { %1536 = vmatmul.mubr.msk.f32.vlgmr.msra.gmra.mxu0 %vm235_vm1, %v761_v21 }
 0x97a   :  { %991 = vmatpush1.msra.mxu0 %v1939_v2  ;;  %1038 = vmatprep.mubr.f32.mxu0 %v1835_v0 }
 0x97b   :  { %992 = vmatprep.subr.mxu0 %v1941_v3 }
 0x97c   :  { %993 = vmatpush1.msra.mxu0 %v1944_v4 }
 0x97d   :  { %994 = vmatprep.subr.mxu0 %v1947_v5 }
 0x97e   :  { %995 = vmatpush1.msra.mxu0 %v1950_v6 }
 0x97f   :  { %996 = vmatprep.subr.mxu0 %v1953_v8 }
 0x980   :  { %997 = vmatpush1.msra.mxu0 %v1959_v11 }
 0x981   :  { %998 = vmatprep.subr.mxu0 %v1962_v12 }
 0x982   :  { %999 = vmatpush1.msra.mxu0 %v1971_v14 }
 0x983   :  { %1000 = vmatprep.subr.mxu0 %v1976_v15 }
 0x984   :  { %1001 = vmatpush1.msra.mxu0 %v1980_v16 }
 0x985   :  { %1002 = vmatprep.subr.mxu0 %v1984_v17 }
 0x986   :  { %1003 = vmatpush1.msra.mxu0 %v1988_v18 }
 0x987   :  { %1004 = vmatprep.subr.mxu0 %v1992_v19 }
 0x988   :  { %1005 = vmatpush1.msra.mxu0 %v1996_v20 }
 0xa39   :  { %v830_v22 = vpop.f32.mrf.mxu0 }
 0xa3a   :  { %v837_v23 = vrot.slane %v830_v22, 6 }
 0xa3b   :  { %v832_v24 = vpop.f32.mrf.mxu0 }
 0xa3c   :  { %v841_v25 = vadd.f32 %v837_v23, %v2179_v38  ;;  %v838_v27 = vrot.slane %v832_v24, 6 }
 0xa3e   :  { %1628 = vtanh.f32 %v841_v25  ;;  %v842_v28 = vadd.f32 %v838_v27, %v2183_v51 }
 0xa40   :  { %1630 = vtanh.f32 %v842_v28 }
 0xa4b   :  { %v1629_v31 = vpop.eup %1628 }
 0xa4c   :  { %v845_v32 = vmul.f32 0.5, %v1629_v31 }
 0xa4d   :  { %v1631_v34 = vpop.eup %1630 }
 0xa4e   :  { %v846_v36 = vmul.f32 0.5, %v1631_v34  ;;  %v847_v41 = vadd.f32 0.5, %v845_v32 }
 0xa50   :  { %v848_v42 = vadd.f32 0.5, %v846_v36  ;;  %v854_v29 = vmul.f32 %v852_v35, %v847_v41 }
 0xa52   :  { %v850_v43 = vsel %vm230_vm2, %v1631_v34, %v848_v42 }
 0xa53   :  { %v855_v44 = vmul.f32 %v850_v43, %v847_v41 }
 0xa55   :  { %857 = vrot.lane.b32.xlu1 %v855_v44, %s1836_s27 }
 0xac7   :  { %v858_v33 = vpop.permute.xlu1 %857 }
 0xac8   :  { %v860_v45 = vadd.f32 %v858_v33, %v854_v29 }
 0xaca   :  { %1632 = vtanh.f32 %v860_v45 }
 0xad7   :  { %v1633_v46 = vpop.eup %1632 }
 0xad8   :  { %v2216_v47 = vmul.f32 %v1633_v46, %v850_v43 }
 0xada   :  { %v864_v48 = vrot.slane %v2216_v47, 2 }
 0xadc   :  { %865 = vrot.lane.b32.xlu0 %v864_v48, %s1836_s27 }
 0xb4e   :  { %v866_v49 = vpop.permute.xlu0 %865 }
 0xb4f   :  { %1537 = vmatmul.mubr.msk.f32.vlgmr.msra.gmra.mxu1 %vm235_vm1, %v866_v49 }
 0xb50   :  { %1096 = vmatpush1.msra.mxu1 %v1939_v2  ;;  %1143 = vmatprep.mubr.f32.mxu1 %v1835_v0 }
 0xb51   :  { %1097 = vmatprep.subr.mxu1 %v1941_v3 }
 0xb52   :  { %1098 = vmatpush1.msra.mxu1 %v1944_v4 }
 0xb53   :  { %1099 = vmatprep.subr.mxu1 %v1947_v5 }
 0xb54   :  { %1100 = vmatpush1.msra.mxu1 %v1950_v6 }
 0xb55   :  { %1101 = vmatprep.subr.mxu1 %v1953_v8 }
 0xb56   :  { %1102 = vmatpush1.msra.mxu1 %v1959_v11 }
 0xb57   :  { %1103 = vmatprep.subr.mxu1 %v1962_v12 }
 0xb58   :  { %1104 = vmatpush1.msra.mxu1 %v1971_v14  ;;  %v957_v14 = vrot.slane %v860_v45, 6 }
 0xb59   :  { %1105 = vmatprep.subr.mxu1 %v1976_v15 }
 0xb5a   :  { %1106 = vmatpush1.msra.mxu1 %v1980_v16 }
 0xb5b   :  { %1107 = vmatprep.subr.mxu1 %v1984_v17 }
 0xb5c   :  { %1108 = vmatpush1.msra.mxu1 %v1988_v18 }
 0xb5d   :  { %1109 = vmatprep.subr.mxu1 %v1992_v19 }
 0xb5e   :  { %1110 = vmatpush1.msra.mxu1 %v1996_v20 }
 0xc0f   :  { %v935_v0 = vpop.f32.mrf.mxu1 }
 0xc10   :  { %v942_v2 = vrot.slane %v935_v0, 4 }
 0xc11   :  { %v937_v3 = vpop.f32.mrf.mxu1 }
 0xc12   :  { %v946_v4 = vadd.f32 %v942_v2, %v2179_v38  ;;  %v943_v5 = vrot.slane %v937_v3, 4 }
 0xc14   :  { %1634 = vtanh.f32 %v946_v4  ;;  %v947_v6 = vadd.f32 %v943_v5, %v2183_v51 }
 0xc16   :  { %1636 = vtanh.f32 %v947_v6 }
 0xc21   :  { %v1635_v8 = vpop.eup %1634 }
 0xc22   :  { %v950_v11 = vmul.f32 0.5, %v1635_v8 }
 0xc23   :  { %v1637_v12 = vpop.eup %1636 }
 0xc24   :  { %v951_v15 = vmul.f32 0.5, %v1637_v12  ;;  %v952_v16 = vadd.f32 0.5, %v950_v11 }
 0xc26   :  { %v953_v17 = vadd.f32 0.5, %v951_v15  ;;  %v959_v18 = vmul.f32 %v957_v14, %v952_v16 }
 0xc28   :  { %v955_v19 = vsel %vm230_vm2, %v1637_v12, %v953_v17 }
 0xc29   :  { %v960_v20 = vmul.f32 %v955_v19, %v952_v16 }
 0xc2b   :  { %962 = vrot.lane.b32.xlu1 %v960_v20, %s1836_s27 }
 0xc9d   :  { %v963_v50 = vpop.permute.xlu1 %962 }
 0xc9e   :  { %v965_v40 = vadd.f32 %v963_v50, %v959_v18 }
 0xca0   :  { %1638 = vtanh.f32 %v965_v40  ;;  %v1062_v60 = vrot.slane %v965_v40, 6 }
 0xcad   :  { %v1639_v52 = vpop.eup %1638 }
 0xcae   :  { %v967_v53 = vmul.f32 %v1639_v52, %v955_v19 }
 0xcb0   :  { %v969_v54 = vrot.slane %v967_v53, 4  ;;  %v1204_v27 = vrot.slane %v967_v53, 2 }
 0xcb2   :  { %970 = vrot.lane.b32.xlu0 %v969_v54, %s1836_s27  ;;  %v1219_v34 = vsel %vm1213_vm4, %v864_v48, %v1204_v27 }
 0xd24   :  { %v971_v55 = vpop.permute.xlu0 %970 }
 0xd25   :  { %1538 = vmatmul.mubr.msk.f32.vlgmr.msra.gmra.mxu0 %vm235_vm1, %v971_v55  ;;  %v1540_v55 = vld [vmem:[#allocation7] ss:$0 sm:$0xff] }
 0xde5   :  { %v1040_v56 = vpop.f32.mrf.mxu0 }
 0xde6   :  { %v1047_v57 = vrot.slane %v1040_v56, 2 }
 0xde7   :  { %v1042_v1 = vpop.f32.mrf.mxu0 }
 0xde8   :  { %v1051_v58 = vadd.f32 %v1047_v57, %v2179_v38  ;;  %v1048_v61 = vrot.slane %v1042_v1, 2 }
 0xdea   :  { %1640 = vtanh.f32 %v1051_v58  ;;  %v1052_v26 = vadd.f32 %v1048_v61, %v2183_v51 }
 0xdec   :  { %1642 = vtanh.f32 %v1052_v26  ;;  %v1541_v26 = vld [vmem:[#allocation8] ss:$0 sm:$0xff] }
 0xdf7   :  { %v1641_v59 = vpop.eup %1640 }
 0xdf8   :  { %v1055_v62 = vmul.f32 0.5, %v1641_v59 }
 0xdf9   :  { %v1643_v30 = vpop.eup %1642 }
 0xdfa   :  { %v1056_v63 = vmul.f32 0.5, %v1643_v30  ;;  %v1057_v7 = vadd.f32 0.5, %v1055_v62 }
 0xdfc   :  { %v1058_v9 = vadd.f32 0.5, %v1056_v63  ;;  %v1064_v10 = vmul.f32 %v1062_v60, %v1057_v7  ;;  %v1291_v63 = vld [vmem:[%s2344_s8 + $0x18] sm:$0xff] }
 0xdfd   :  { %1560 = vmatprep.subr.mxu0 %v1291_v63 }
 0xdfe   :  { %v1060_v21 = vsel %vm230_vm2, %v1643_v30, %v1058_v9  ;;  %1561 = vmatpush3.msra.mxu0 %v1291_v63 }
 0xdff   :  { %v1065_v22 = vmul.f32 %v1060_v21, %v1057_v7  ;;  %v1290_v7 = vld [vmem:[%s2344_s8 + $0x10] sm:$0xff] }
 0xe00   :  { %1562 = vmatprep.subr.mxu0 %v1290_v7 }
 0xe01   :  { %1067 = vrot.lane.b32.xlu1 %v1065_v22, %s1836_s27  ;;  %1563 = vmatpush3.msra.mxu0 %v1290_v7 }
 0xe73   :  { %v1068_v23 = vpop.permute.xlu1 %1067 }
 0xe74   :  { %v2251_v24 = vadd.f32 %v1068_v23, %v1064_v10  ;;  %v1289_v10 = vld [vmem:[%s2344_s8 + $0x8] sm:$0xff] }
 0xe75   :  { %1564 = vmatprep.subr.mxu0 %v1289_v10 }
 0xe76   :  { %1644 = vtanh.f32 %v2251_v24  ;;  %1565 = vmatpush3.msra.mxu0 %v1289_v10 }
 0xe83   :  { %v1645_v25 = vpop.eup %1644 }
 0xe84   :  { %v1072_v28 = vmul.f32 %v1645_v25, %v1060_v21  ;;  %v1288_v25 = vld [vmem:[%s2344_s8] sm:$0xff] }
 0xe85   :  { %1566 = vmatprep.subr.mxu0 %v1288_v25 }
 0xe86   :  { %v1074_v31 = vrot.slane %v1072_v28, 6  ;;  %v1206_v32 = vrot.slane %v1072_v28, 2  ;;  %1567 = vmatpush3.msra.mxu0 %v1288_v25 }
 0xe88   :  { %1075 = vrot.lane.b32.xlu0 %v1074_v31, %s1836_s27  ;;  %v1220_v35 = vsel %vm1215_vm5, %v1219_v34, %v1206_v32 }
 0xefa   :  { %v1076_v36 = vpop.permute.xlu0 %1075 }
 0xefb   :  { %1539 = vmatmul.mubr.msk.f32.vlgmr.msra.gmra.mxu1 %vm235_vm1, %v1076_v36 }
 0xfbb   :  { %v1145_v41 = vpop.f32.mrf.mxu1 }
 0xfbc   :  { %v1152_v42 = vrot.slane %v1145_v41, 2 }
 0xfbd   :  { %v1147_v29 = vpop.f32.mrf.mxu1 }
 0xfbe   :  { %v1156_v43 = vadd.f32 %v1152_v42, %v2179_v38  ;;  %v1153_v44 = vrot.slane %v1147_v29, 2  ;;  %v1191_v29 = vrot.slane %v2251_v24, 6 }
 0xfc0   :  { %1646 = vtanh.f32 %v1156_v43  ;;  %v1157_v33 = vadd.f32 %v1153_v44, %v2183_v51 }
 0xfc2   :  { %1648 = vtanh.f32 %v1157_v33 }
 0xfcd   :  { %v1647_v45 = vpop.eup %1646 }
 0xfce   :  { %v1160_v47 = vmul.f32 0.5, %v1647_v45 }
 0xfcf   :  { %v1649_v46 = vpop.eup %1648 }
 0xfd0   :  { %v1161_v48 = vmul.f32 0.5, %v1649_v46  ;;  %v1162_v0 = vadd.f32 0.5, %v1160_v47  ;;  %v1389_v47 = vld [vmem:[#allocation10 + $0x18] sm:$0xff] }
 0xfd1   :  { %1571 = vmatprep.subr.mxu0 %v1389_v47 }
 0xfd2   :  { %v1163_v49 = vadd.f32 0.5, %v1161_v48  ;;  %v1166_v4 = vmul.f32 %v1162_v0, %v2251_v24  ;;  %v1388_v48 = vld [vmem:[#allocation10 + $0x10] sm:$0xff]  ;;  %v1387_v24 = vld [vmem:[#allocation10 + $0x8] sm:$0xff] }
 0xfd4   :  { %v1165_v2 = vsel %vm230_vm2, %v1649_v46, %v1163_v49  ;;  %v1386_v49 = vld [vmem:[#allocation10] sm:$0xff] }
 0xfd5   :  { %v1167_v3 = vmul.f32 %v1165_v2, %v1162_v0  ;;  %v1542_v0 = vld [vmem:[%s2345_s9] ss:$0 sm:$0xff] }
 0xfd7   :  { %1169 = vrot.lane.b32.xlu1 %v1167_v3, %s1836_s27 }
0x1049   :  { %v1170_v38 = vpop.permute.xlu1 %1169 }
0x104a   :  { %v2266_v5 = vadd.f32 %v1170_v38, %v1166_v4 }
0x104c   :  { %1650 = vtanh.f32 %v2266_v5  ;;  %v1186_v34 = vrot.slane %v2266_v5, 6 }
0x1059   :  { %v1651_v51 = vpop.eup %1650 }
0x105a   :  { %v1174_v6 = vmul.f32 %v1651_v51, %v1165_v2 }
0x105c   :  { %v1179_v8 = vrot.slane %v1174_v6, 6 }
0x105e   :  { %1180 = vrot.lane.b32.xlu0 %v1179_v8, %s1836_s27 }
0x1062   :  { %1224 = vrot.lane.b32.xlu0 %v2192_v13, %s1837_s0 }
0x10d0   :  { %v1181_v11 = vpop.permute.xlu0 %1180 }
0x10d1   :  { %v1184_v12 = vsel %vm2274_vm9, %v1181_v11, %v1076_v36 }
0x10d2   :  { %v1209_v14 = vrot.slane %v1184_v12, 2  ;;  %1481 = vst.msk [vmem:[#allocation12] sm:$0x3] %vm1480_vm10, %v1184_v12 }
0x10d4   :  { %1210 = vrot.lane.b32.xlu1 %v1209_v14, %s1836_s27  ;;  %v1225_v15 = vpop.permute.xlu0 %1224 }
0x10d5   :  { %v1231_v16 = vsel %vm1230_vm11, %v1225_v15, 0.0 }
0x10d6   :  { %1232 = vadd.xlane.f32.xlu0 %v1231_v16 }
0x1146   :  { %v1211_v37 = vpop.permute.xlu1 %1210 }
0x1147   :  { %v1221_v17 = vsel %vm1217_vm6, %v1220_v35, %v1211_v37 }
0x1148   :  { %1226 = vrot.lane.b32.xlu1 %v1221_v17, %s1837_s0 }
0x115f   :  { %v1233_v18 = vpop.xlane.xlu0 %1232 }
0x1160   :  { %v1238_v19 = vmul.f32 0.03125, %v1233_v18 }
0x1162   :  { %v1240_v20 = vsub.f32 %v2192_v13, %v1238_v19 }
0x1164   :  { %v1242_v50 = vmul.f32 %v1240_v20, %v1240_v20 }
0x1166   :  { %1246 = vrot.lane.b32.xlu0 %v1242_v50, %s1837_s0 }
0x11ba   :  { %v1227_v40 = vpop.permute.xlu1 %1226 }
0x11bb   :  { %v1234_v52 = vsel %vm1230_vm11, %v1227_v40, 0.0 }
0x11bc   :  { %1235 = vadd.xlane.f32.xlu1 %v1234_v52 }
0x11d8   :  { %v1247_v53 = vpop.permute.xlu0 %1246 }
0x11d9   :  { %v1252_v54 = vsel %vm1230_vm11, %v1247_v53, 0.0 }
0x11da   :  { %1253 = vadd.xlane.f32.xlu0 %v1252_v54 }
0x11f0   :  { %1272 = vrot.lane.b32.xlu0 %v1540_v55, %s1838_s30 }
0x1245   :  { %v1236_v56 = vpop.xlane.xlu1 %1235 }
0x1246   :  { %v1239_v57 = vmul.f32 0.03125, %v1236_v56 }
0x1248   :  { %v1241_v1 = vsub.f32 %v1221_v17, %v1239_v57 }
0x124a   :  { %v1243_v58 = vmul.f32 %v1241_v1, %v1241_v1 }
0x124c   :  { %1248 = vrot.lane.b32.xlu1 %v1243_v58, %s1837_s0 }
0x1263   :  { %v1254_v59 = vpop.xlane.xlu0 %1253 }
0x1264   :  { %v1258_v62 = vmul.f32 0.03125, %v1254_v59 }
0x1266   :  { %v1260_v30 = vadd.f32 1e-05, %v1258_v62 }
0x1267   :  { %v1273_v21 = vpop.permute.xlu0 %1272 }
0x1268   :  { %1652 = vrsqrt.f32 %v1260_v30 }
0x1275   :  { %v1653_v60 = vpop.eup %1652 }
0x1276   :  { %v1264_v9 = vmul.f32 %v1653_v60, %v1240_v20 }
0x1278   :  { %v1275_v27 = vmul.f32 %v1273_v21, %v1264_v9 }
0x12be   :  { %v1249_v13 = vpop.permute.xlu1 %1248 }
0x12bf   :  { %v1255_v61 = vsel %vm1230_vm11, %v1249_v13, 0.0 }
0x12c0   :  { %1256 = vadd.xlane.f32.xlu1 %v1255_v61 }
0x12d1   :  { %1283 = vrot.lane.b32.xlu1 %v1541_v26, %s1838_s30 }
0x1349   :  { %v1257_v22 = vpop.xlane.xlu1 %1256 }
0x134a   :  { %v1259_v23 = vmul.f32 0.03125, %v1257_v22 }
0x134c   :  { %v1261_v28 = vadd.f32 1e-05, %v1259_v23 }
0x134d   :  { %v1284_v31 = vpop.permute.xlu1 %1283 }
0x134e   :  { %1654 = vrsqrt.f32 %v1261_v28  ;;  %v1286_v32 = vadd.f32 %v1284_v31, %v1275_v27 }
0x1350   :  { %1301 = vrot.lane.b32.xlu0 %v1286_v32, %s1837_s0 }
0x1354   :  { %1187 = vrot.lane.b32.xlu0 %v1186_v34, %s1836_s27 }
0x135b   :  { %v1655_v35 = vpop.eup %1654 }
0x135c   :  { %v1265_v36 = vmul.f32 %v1655_v35, %v1241_v1 }
0x135e   :  { %v1276_v41 = vmul.f32 %v1273_v21, %v1265_v36 }
0x1360   :  { %v1287_v42 = vadd.f32 %v1284_v31, %v1276_v41 }
0x1362   :  { %1303 = vrot.lane.b32.xlu1 %v1287_v42, %s1837_s0 }
0x1366   :  { %1192 = vrot.lane.b32.xlu1 %v1191_v29, %s1836_s27 }
0x13c2   :  { %v1302_v43 = vpop.permute.xlu0 %1301 }
0x13c3   :  { %1568 = vmatprep.mubr.msk.f32.mxu0 %vm1230_vm11, %v1302_v43 }
0x13c6   :  { %v1188_v33 = vpop.permute.xlu0 %1187 }
0x13d4   :  { %v1304_v44 = vpop.permute.xlu1 %1303 }
0x13d5   :  { %1569 = vmatmul.mubr.msk.f32.vlgmr.msra.gmra.mxu0 %vm1230_vm11, %v1304_v44 }
0x13d6   :  { %1572 = vmatpush3.msra.mxu0 %v1389_v47 }
0x13d7   :  { %1573 = vmatprep.subr.mxu0 %v1388_v48 }
0x13d8   :  { %v1193_v45 = vpop.permute.xlu1 %1192  ;;  %1574 = vmatpush3.msra.mxu0 %v1388_v48 }
0x13d9   :  { %v1195_v46 = vsel %vm2274_vm9, %v1188_v33, %v1193_v45  ;;  %1575 = vmatprep.subr.mxu0 %v1387_v24 }
0x13da   :  { %1482 = vst.msk [vmem:[#allocation14] sm:$0x3] %vm1480_vm10, %v1195_v46  ;;  %1576 = vmatpush3.msra.mxu0 %v1387_v24 }
0x13db   :  { %1577 = vmatprep.subr.mxu0 %v1386_v49 }
0x13dc   :  { %1578 = vmatpush3.msra.mxu0 %v1386_v49 }
0x1495   :  { %v1570_v2 = vpop.f32.mrf.mxu0 }
0x1496   :  { %v1381_v3 = vadd.f32 %v1570_v2, %v1542_v0 }
0x1497   :  { %v1375_v4 = vpop.f32.mrf.mxu0 }
0x1498   :  { %v1376_v38 = vadd.f32 %v1542_v0, %v1375_v4  ;;  %v1385_v51 = vmax.f32 %v1381_v3, 0.0 }
0x149a   :  { %v1384_v5 = vmax.f32 %v1376_v38, 0.0 }
0x149c   :  { %1579 = vmatprep.mubr.msk.f32.mxu0 %vm1230_vm11, %v1384_v5 }
0x149d   :  { %1580 = vmatmul.mubr.msk.f32.vlgmr.msra.gmra.mxu0 %vm1230_vm11, %v1385_v51 }
0x149e   :  { %1767 = shalt.err (!%p1764_p1)
}
0x149f   :  { %1504 = dma.vmem_to_hbm [thread:$0]  %s1502_s6, 32, %s2349_s13, [#allocation13]  }
0x14a0   :  { %s1840_s26 = smov [#allocation14]  }
0x14a1   :  { %s1511_s27 = sshll.u32 %s1840_s26, 4  ;;  %s1512_s27 = int_to_ptr.vmem [resolvable:$true] %s1511_s27 }
0x14a2   :  { %s1776_s2 = scalar_lea.vmem %s1512_s27, 32  ;;  %p1781_p3 = scmp.lt.s32.totalorder %s1512_s27, %s1512_s27 }
0x14a3   :  { %p1777_p2 = scmp.ne.s32.totalorder %s1512_s27, %s1776_s2  ;;  %p1782_p4 = scmp.lt.s32.totalorder %s1776_s2, %s1776_s2 }
0x14a5   :  { %p1783_p5 = por %p1782_p4, %p1781_p3 }
0x14a7   :  { %p1784_p6 = pnand %p1783_p5, %p1777_p2 }
0x14a9   :  { %1787 = shalt.err (!%p1784_p6)
}
0x14aa   :  { %1514 = dma.vmem_to_hbm [thread:$0]  %s1512_s27, 32, %s2350_s14, [#allocation13]   ;;  %v1545_v6 = vld [vmem:[%s2347_s11] ss:$0 sm:$0xff] }
0x14ab   :  { %s1841_s13 = smov [#allocation11]  }
0x14ac   :  { %s1488_s29 = sshll.u32 %s1841_s13, 4  ;;  %s1489_s29 = int_to_ptr.vmem [resolvable:$true] %s1488_s29 }
0x14ad   :  { %s1796_s0 = scalar_lea.vmem %s1489_s29, 256  ;;  %p1801_p8 = scmp.lt.s32.totalorder %s1489_s29, %s1489_s29 }
0x14ae   :  { %p1797_p7 = scmp.ne.s32.totalorder %s1489_s29, %s1796_s0  ;;  %p1802_p9 = scmp.lt.s32.totalorder %s1796_s0, %s1796_s0 }
0x14b0   :  { %p1803_p10 = por %p1802_p9, %p1801_p8 }
0x14b2   :  { %p1804_p11 = pnand %p1803_p10, %p1797_p7 }
0x155d   :  { %v1581_v8 = vpop.f32.mrf.mxu0 }
0x155e   :  { %v1475_v39 = vadd.f32 %v1581_v8, %v1545_v6 }
0x155f   :  { %v1469_v11 = vpop.f32.mrf.mxu0 }
0x1560   :  { %1479 = vst.msk [vmem:[#allocation11 + $0x8] sm:$0xff] %vm1230_vm11, %v1475_v39  ;;  %v1470_v12 = vadd.f32 %v1545_v6, %v1469_v11 }
0x1562   :  { %1478 = vst.msk [vmem:[#allocation11] sm:$0xff] %vm1230_vm11, %v1470_v12 }
0x1563   :  { %1807 = shalt.err (!%p1804_p11)
}
0x1564   :  { %1494 = dma.vmem_to_hbm [thread:$0]  %s1489_s29, 256, %s2348_s12, [#allocation4], %s1833_s3, %s1833_s3, %s1834_s22  }
0x1565   :  { %1822 = dma.done.wait [#allocation4], 256  }
0x1566   :  { %1823 = vsyncadd [#allocation4], 4294967040 }
0x1567   :  { %1824 = dma.done.wait [#allocation13], 64  }
0x1568   :  { %1825 = vsyncadd [#allocation13], 4294967232 }
0x1569   :  { %1524 = vsyncpa [#allocation3], 1 }
0x156a   :  { %1525 = vsyncpa [#allocation6], 1 }
0x156b   :  { %1526 = vsyncpa [#allocation9], 1 }
0x156c   :  { %1527 = vsyncpa [#allocation4], 1 }
0x156d   :  { %1528 = vsyncpa [#allocation13], 1 }

</bundles_post_ra>
